<compile_context>
chip_gen: v6e
topology: v6e:2x2x1
jax: 0.10.0
libtpu: 0.0.40
codegen_flags: <defaults>
</compile_context>

<pallas_src>
import jax
import jax.numpy as jnp
import numpy as np
from jax import lax
from jax.experimental import pallas as pl
from jax.experimental.pallas import tpu as pltpu

BN_EPS = 1e-5


def stem_kernel(xf_ref, t1_ref, b1s_ref, gamma_ref, beta_ref, t2_ref, b2_ref,
                pmean_ref, out_ref, hidp_ref):
    n, h_pad, _ = xf_ref.shape
    h = h_pad - 2
    wc = out_ref.shape[-1]
    f32 = jnp.float32

    # conv2 needs a 1-row H halo of the hidden activation; zero only the two border rows
    # of the scratch (they stay zero -- the interior is overwritten per image).
    hidp_ref[0:1, :] = jnp.zeros((1, wc), f32)
    hidp_ref[h + 1:h + 2, :] = jnp.zeros((1, wc), f32)

    t1 = t1_ref[...]        # [3, W*Cin, 2*W*Cout]  fused conv1 + skip banded weights
    t2 = t2_ref[...]        # [3, W*Cout, W*Cout]   conv2 banded weights
    b1s = b1s_ref[...]      # [1, 2*W*Cout]

    # ---- pass 1: fused conv1 + skip conv (3 MXU matmuls / image), BN statistics ----
    y1_list, ys_list = [], []
    s1 = jnp.zeros((1, wc), f32)
    s2 = jnp.zeros((1, wc), f32)
    for i in range(n):                                   # static, tiny batch
        xi = xf_ref[i]                                   # [H+2, W*Cin]
        acc = jnp.dot(xi[0:h, :], t1[0], preferred_element_type=f32)
        for dy in (1, 2):
            acc = acc + jnp.dot(xi[dy:dy + h, :], t1[dy], preferred_element_type=f32)
        acc = acc + b1s                                  # [H, 2*W*Cout]
        y1 = acc[:, :wc]                                 # conv1 output  (lane = w*C + c)
        ys = acc[:, wc:]                                 # skip-conv output
        y1_list.append(y1)
        ys_list.append(ys)
        s1 = s1 + jnp.sum(y1, axis=0, keepdims=True)
        s2 = s2 + jnp.sum(y1 * y1, axis=0, keepdims=True)

    # ---- BatchNorm (training-mode batch statistics, biased variance) ----
    # pmean sums the W lane groups of each channel and divides by N*H*W. These two
    # [1,128]x[128,128] dots are negligible work, so keep them exact (HIGHEST / f32).
    mu = jnp.dot(s1, pmean_ref[...], precision=lax.Precision.HIGHEST,
                 preferred_element_type=f32)
    ex2 = jnp.dot(s2, pmean_ref[...], precision=lax.Precision.HIGHEST,
                  preferred_element_type=f32)
    var = ex2 - mu * mu
    scale = lax.rsqrt(var + BN_EPS) * gamma_ref[...]     # [1, W*Cout]
    shift = beta_ref[...] - mu * scale                   # [1, W*Cout]

    b2 = b2_ref[...]
    # ---- pass 2: BN + ReLU + conv2, accumulated on top of (skip + bias) ----
    for i in range(n):
        hid = jnp.maximum(y1_list[i] * scale + shift, 0.0)   # [H, W*Cout]
        hidp_ref[1:h + 1, :] = hid
        hidp = hidp_ref[...]                                 # [H+2, W*Cout]
        acc = ys_list[i] + b2
        for dy in range(3):
            acc = acc + jnp.dot(hidp[dy:dy + h, :], t2[dy], preferred_element_type=f32)
        out_ref[i] = acc.astype(out_ref.dtype)               # lane-dense (128-wide) store


def _banded_weights(wk, w):
    """HWIO conv weight [3, 3, Ci, Co] -> banded Toeplitz matrices [3, W*Ci, W*Co].

    Row index = wi*Ci + ci (input column / channel), column index = wo*Co + co.
    The 'same' zero padding along W is folded into the band structure.
    """
    wk = wk.astype(jnp.float32)
    ci, co = wk.shape[2], wk.shape[3]
    wi = jnp.arange(w)[:, None]
    wo = jnp.arange(w)[None, :]
    dx = wi - wo + 1                                     # which kx tap feeds wi -> wo
    valid = ((dx >= 0) & (dx <= 2)).astype(jnp.float32)
    g = wk[:, jnp.clip(dx, 0, 2), :, :]                  # [3, W, W, Ci, Co]
    g = g * valid[None, :, :, None, None]
    g = jnp.transpose(g, (0, 1, 3, 2, 4))                # [3, wi, ci, wo, co]
    return g.reshape(3, w * ci, w * co)


@jax.jit
def stem_forward(x_nchw, w1, b1, gamma, beta, w2, b2, ws, bs):
    """x_nchw: [N, Cin, H, W] f32. Weights w*: [3,3,Cin*,Cout] HWIO. Bias/BN vecs: [Cout]."""
    n, cin, h, w = x_nchw.shape
    cout = w1.shape[-1]
    wc = w * cout

    # NCHW -> NHWC -> fuse (W, C) onto the lane axis; pad only H (W padding lives in the
    # banded weights).
    x = jnp.transpose(x_nchw, (0, 2, 3, 1)).astype(jnp.float32)
    xf = jnp.pad(x.reshape(n, h, w * cin), ((0, 0), (1, 1), (0, 0)))

    t1 = jnp.concatenate([_banded_weights(w1, w), _banded_weights(ws, w)], axis=-1)
    t2 = _banded_weights(w2, w)

    tile = lambda v: jnp.tile(v.astype(jnp.float32), w).reshape(1, wc)
    b1s = jnp.concatenate([tile(b1), tile(bs)], axis=-1)      # [1, 2*W*Cout]
    gamma_f, beta_f, b2_f = tile(gamma), tile(beta), tile(b2)

    lane = jnp.arange(wc)
    pmean = ((lane[:, None] % cout) == (lane[None, :] % cout)).astype(jnp.float32)
    pmean = pmean / float(n * h * w)

    # TODO(synk): for large H/W/C the whole problem no longer fits in VMEM; split into a
    # stats pass and an apply pass (two pallas_calls with a row-tiled 'parallel' grid),
    # since train-mode BatchNorm couples the entire batch and prevents tiling a single
    # fused kernel.
    outf = pl.pallas_call(
        stem_kernel,
        out_shape=jax.ShapeDtypeStruct((n, h, wc), jnp.float32),
        in_specs=[pl.BlockSpec(memory_space=pltpu.MemorySpace.VMEM)] * 8,
        out_specs=pl.BlockSpec(memory_space=pltpu.MemorySpace.VMEM),
        scratch_shapes=[pltpu.VMEM((h + 2, wc), jnp.float32)],
        compiler_params=pltpu.CompilerParams(vmem_limit_bytes=32 * 1024 * 1024),
    )(xf, t1, b1s, gamma_f, beta_f, t2, b2_f, pmean)

    # Back to NCHW to match the PyTorch module's output convention.
    return jnp.transpose(outf.reshape(n, h, w, cout), (0, 3, 1, 2))


def _ref_forward(x_nchw, w1, b1, gamma, beta, w2, b2, ws, bs):
    """Pure-JAX reference (NHWC convs via lax.conv_general_dilated, f32 HIGHEST)."""
    x = jnp.transpose(x_nchw, (0, 2, 3, 1)).astype(jnp.float32)

    def conv(inp, wgt, bias):
        o = lax.conv_general_dilated(
            inp, wgt, window_strides=(1, 1), padding="SAME",
            dimension_numbers=("NHWC", "HWIO", "NHWC"),
            precision=lax.Precision.HIGHEST)
        return o + bias.reshape(1, 1, 1, -1)

    y1 = conv(x, w1, b1)
    mu = jnp.mean(y1, axis=(0, 1, 2), keepdims=True)
    var = jnp.mean((y1 - mu) ** 2, axis=(0, 1, 2), keepdims=True)
    hid = (y1 - mu) * lax.rsqrt(var + BN_EPS)
    hid = hid * gamma.reshape(1, 1, 1, -1) + beta.reshape(1, 1, 1, -1)
    hid = jnp.maximum(hid, 0.0)
    y2 = conv(hid, w2, b2)
    ys = conv(x, ws, bs)
    return jnp.transpose(y2 + ys, (0, 3, 1, 2))


if __name__ == "__main__":
    key = jax.random.PRNGKey(0)
    N, CIN, H, W = 2, 4, 16, 16
    COUT = 8

    keys = jax.random.split(key, 10)
    x = jax.random.normal(keys[0], (N, CIN, H, W), jnp.float32)

    # Deterministic synthetic parameters (shapes follow nn.Conv2d / nn.BatchNorm2d).
    w1 = jax.random.normal(keys[1], (3, 3, CIN, COUT), jnp.float32) * 0.1
    b1 = jax.random.normal(keys[2], (COUT,), jnp.float32) * 0.1
    gamma = 1.0 + 0.1 * jax.random.normal(keys[3], (COUT,), jnp.float32)
    beta = 0.1 * jax.random.normal(keys[4], (COUT,), jnp.float32)
    w2 = jax.random.normal(keys[5], (3, 3, COUT, COUT), jnp.float32) * 0.1
    b2 = jax.random.normal(keys[6], (COUT,), jnp.float32) * 0.1
    ws = jax.random.normal(keys[7], (3, 3, CIN, COUT), jnp.float32) * 0.1
    bs = jax.random.normal(keys[8], (COUT,), jnp.float32) * 0.1

    out = stem_forward(x, w1, b1, gamma, beta, w2, b2, ws, bs)
    out = jax.block_until_ready(out)

    ref = _ref_forward(x, w1, b1, gamma, beta, w2, b2, ws, bs)
    # Tolerance loosened vs the f32/HIGHEST reference because the kernel's conv matmuls
    # use DEFAULT (bf16 MXU, f32 accumulate) precision per the performance guidance.
    np.testing.assert_allclose(np.asarray(out), np.asarray(ref), rtol=2e-2, atol=2e-2)

    assert out.shape == (N, COUT, H, W)
    print("KERNEL_OK")
</pallas_src>

<mosaic_0001>
module attributes {stable_mosaic.version = 11 : i64} {
  func.func @stem_kernel(%arg0: memref<2x18x64xf32, #tpu.memory_space<vmem>>, %arg1: memref<3x64x256xf32, #tpu.memory_space<vmem>>, %arg2: memref<1x256xf32, #tpu.memory_space<vmem>>, %arg3: memref<1x128xf32, #tpu.memory_space<vmem>>, %arg4: memref<1x128xf32, #tpu.memory_space<vmem>>, %arg5: memref<3x128x128xf32, #tpu.memory_space<vmem>>, %arg6: memref<1x128xf32, #tpu.memory_space<vmem>>, %arg7: memref<128x128xf32, #tpu.memory_space<vmem>>, %arg8: memref<2x16x128xf32, #tpu.memory_space<vmem>>, %arg9: memref<18x128xf32, #tpu.memory_space<vmem>>) attributes {dimension_semantics = [], scalar_prefetch = 0 : i64, scratch_operands = 1 : i64, tpu.core_type = #tpu.core_type<tc>} {
    %cst = arith.constant 0.000000e+00 : f32
    %0 = vector.broadcast %cst : f32 to vector<1x128xf32>
    %c0 = arith.constant 0 : index
    %c0_0 = arith.constant 0 : index
    %1 = vector.load %arg9[%c0, %c0_0] : memref<18x128xf32, #tpu.memory_space<vmem>>, vector<1x128xf32>
    tpu.vector_store %arg9[%c0, %c0_0], %0 {strides = array<i32>} : memref<18x128xf32, #tpu.memory_space<vmem>>, vector<1x128xf32>,
    %cst_1 = arith.constant 0.000000e+00 : f32
    %2 = vector.broadcast %cst_1 : f32 to vector<1x128xf32>
    %c17 = arith.constant 17 : index
    %c0_2 = arith.constant 0 : index
    %3 = vector.load %arg9[%c17, %c0_2] : memref<18x128xf32, #tpu.memory_space<vmem>>, vector<1x128xf32>
    tpu.vector_store %arg9[%c17, %c0_2], %2 {strides = array<i32>} : memref<18x128xf32, #tpu.memory_space<vmem>>, vector<1x128xf32>,
    %c0_3 = arith.constant 0 : index
    %c0_4 = arith.constant 0 : index
    %c0_5 = arith.constant 0 : index
    %4 = vector.load %arg1[%c0_3, %c0_4, %c0_5] : memref<3x64x256xf32, #tpu.memory_space<vmem>>, vector<3x64x256xf32>
    %c0_6 = arith.constant 0 : index
    %c0_7 = arith.constant 0 : index
    %c0_8 = arith.constant 0 : index
    %5 = vector.load %arg5[%c0_6, %c0_7, %c0_8] : memref<3x128x128xf32, #tpu.memory_space<vmem>>, vector<3x128x128xf32>
    %c0_9 = arith.constant 0 : index
    %c0_10 = arith.constant 0 : index
    %6 = vector.load %arg2[%c0_9, %c0_10] : memref<1x256xf32, #tpu.memory_space<vmem>>, vector<1x256xf32>
    %cst_11 = arith.constant 0.000000e+00 : f32
    %7 = vector.broadcast %cst_11 : f32 to vector<1x128xf32>
    %cst_12 = arith.constant 0.000000e+00 : f32
    %8 = vector.broadcast %cst_12 : f32 to vector<1x128xf32>
    %c0_13 = arith.constant 0 : index
    %c0_14 = arith.constant 0 : index
    %c0_15 = arith.constant 0 : index
    %9 = vector.load %arg0[%c0_13, %c0_14, %c0_15] : memref<2x18x64xf32, #tpu.memory_space<vmem>>, vector<1x18x64xf32>
    %10 = vector.shape_cast %9 : vector<1x18x64xf32> to vector<18x64xf32>
    %11 = vector.extract_strided_slice %10 {offsets = [0, 0], sizes = [16, 64], strides = [1, 1]} : vector<18x64xf32> to vector<16x64xf32>
    %12 = vector.extract_strided_slice %4 {offsets = [0, 0, 0], sizes = [1, 64, 256], strides = [1, 1, 1]} : vector<3x64x256xf32> to vector<1x64x256xf32>
    %13 = vector.shape_cast %12 : vector<1x64x256xf32> to vector<64x256xf32>
    %cst_16 = arith.constant dense<0.000000e+00> : vector<16x256xf32>
    %14 = tpu.matmul %11, %13, %cst_16 {dimension_numbers = #tpu.dot_dimension_numbers<[1], [0], [0], [1], [0, 0, 1, 1], [], []>} : vector<16x64xf32>, vector<64x256xf32>, vector<16x256xf32> -> vector<16x256xf32>
    %15 = vector.extract_strided_slice %10 {offsets = [1, 0], sizes = [16, 64], strides = [1, 1]} : vector<18x64xf32> to vector<16x64xf32>
    %16 = vector.extract_strided_slice %4 {offsets = [1, 0, 0], sizes = [1, 64, 256], strides = [1, 1, 1]} : vector<3x64x256xf32> to vector<1x64x256xf32>
    %17 = vector.shape_cast %16 : vector<1x64x256xf32> to vector<64x256xf32>
    %cst_17 = arith.constant dense<0.000000e+00> : vector<16x256xf32>
    %18 = tpu.matmul %15, %17, %cst_17 {dimension_numbers = #tpu.dot_dimension_numbers<[1], [0], [0], [1], [0, 0, 1, 1], [], []>} : vector<16x64xf32>, vector<64x256xf32>, vector<16x256xf32> -> vector<16x256xf32>
    %19 = arith.addf %14, %18 : vector<16x256xf32>
    %20 = vector.extract_strided_slice %10 {offsets = [2, 0], sizes = [16, 64], strides = [1, 1]} : vector<18x64xf32> to vector<16x64xf32>
    %21 = vector.extract_strided_slice %4 {offsets = [2, 0, 0], sizes = [1, 64, 256], strides = [1, 1, 1]} : vector<3x64x256xf32> to vector<1x64x256xf32>
    %22 = vector.shape_cast %21 : vector<1x64x256xf32> to vector<64x256xf32>
    %cst_18 = arith.constant dense<0.000000e+00> : vector<16x256xf32>
    %23 = tpu.matmul %20, %22, %cst_18 {dimension_numbers = #tpu.dot_dimension_numbers<[1], [0], [0], [1], [0, 0, 1, 1], [], []>} : vector<16x64xf32>, vector<64x256xf32>, vector<16x256xf32> -> vector<16x256xf32>
    %24 = arith.addf %19, %23 : vector<16x256xf32>
    %25 = vector.broadcast %6 : vector<1x256xf32> to vector<16x256xf32>
    %26 = arith.addf %24, %25 : vector<16x256xf32>
    %27 = vector.extract_strided_slice %26 {offsets = [0, 0], sizes = [16, 128], strides = [1, 1]} : vector<16x256xf32> to vector<16x128xf32>
    %28 = vector.extract_strided_slice %26 {offsets = [0, 128], sizes = [16, 128], strides = [1, 1]} : vector<16x256xf32> to vector<16x128xf32>
    %cst_19 = arith.constant dense<0.000000e+00> : vector<128xf32>
    %29 = vector.multi_reduction <add>, %27, %cst_19 [0] : vector<16x128xf32> to vector<128xf32>
    %30 = vector.shape_cast %29 : vector<128xf32> to vector<1x128xf32>
    %31 = arith.addf %7, %30 : vector<1x128xf32>
    %32 = arith.mulf %27, %27 : vector<16x128xf32>
    %cst_20 = arith.constant dense<0.000000e+00> : vector<128xf32>
    %33 = vector.multi_reduction <add>, %32, %cst_20 [0] : vector<16x128xf32> to vector<128xf32>
    %34 = vector.shape_cast %33 : vector<128xf32> to vector<1x128xf32>
    %35 = arith.addf %8, %34 : vector<1x128xf32>
    %c1 = arith.constant 1 : index
    %c0_21 = arith.constant 0 : index
    %c0_22 = arith.constant 0 : index
    %36 = vector.load %arg0[%c1, %c0_21, %c0_22] : memref<2x18x64xf32, #tpu.memory_space<vmem>>, vector<1x18x64xf32>
    %37 = vector.shape_cast %36 : vector<1x18x64xf32> to vector<18x64xf32>
    %38 = vector.extract_strided_slice %37 {offsets = [0, 0], sizes = [16, 64], strides = [1, 1]} : vector<18x64xf32> to vector<16x64xf32>
    %39 = vector.extract_strided_slice %4 {offsets = [0, 0, 0], sizes = [1, 64, 256], strides = [1, 1, 1]} : vector<3x64x256xf32> to vector<1x64x256xf32>
    %40 = vector.shape_cast %39 : vector<1x64x256xf32> to vector<64x256xf32>
    %cst_23 = arith.constant dense<0.000000e+00> : vector<16x256xf32>
    %41 = tpu.matmul %38, %40, %cst_23 {dimension_numbers = #tpu.dot_dimension_numbers<[1], [0], [0], [1], [0, 0, 1, 1], [], []>} : vector<16x64xf32>, vector<64x256xf32>, vector<16x256xf32> -> vector<16x256xf32>
    %42 = vector.extract_strided_slice %37 {offsets = [1, 0], sizes = [16, 64], strides = [1, 1]} : vector<18x64xf32> to vector<16x64xf32>
    %43 = vector.extract_strided_slice %4 {offsets = [1, 0, 0], sizes = [1, 64, 256], strides = [1, 1, 1]} : vector<3x64x256xf32> to vector<1x64x256xf32>
    %44 = vector.shape_cast %43 : vector<1x64x256xf32> to vector<64x256xf32>
    %cst_24 = arith.constant dense<0.000000e+00> : vector<16x256xf32>
    %45 = tpu.matmul %42, %44, %cst_24 {dimension_numbers = #tpu.dot_dimension_numbers<[1], [0], [0], [1], [0, 0, 1, 1], [], []>} : vector<16x64xf32>, vector<64x256xf32>, vector<16x256xf32> -> vector<16x256xf32>
    %46 = arith.addf %41, %45 : vector<16x256xf32>
    %47 = vector.extract_strided_slice %37 {offsets = [2, 0], sizes = [16, 64], strides = [1, 1]} : vector<18x64xf32> to vector<16x64xf32>
    %48 = vector.extract_strided_slice %4 {offsets = [2, 0, 0], sizes = [1, 64, 256], strides = [1, 1, 1]} : vector<3x64x256xf32> to vector<1x64x256xf32>
    %49 = vector.shape_cast %48 : vector<1x64x256xf32> to vector<64x256xf32>
    %cst_25 = arith.constant dense<0.000000e+00> : vector<16x256xf32>
    %50 = tpu.matmul %47, %49, %cst_25 {dimension_numbers = #tpu.dot_dimension_numbers<[1], [0], [0], [1], [0, 0, 1, 1], [], []>} : vector<16x64xf32>, vector<64x256xf32>, vector<16x256xf32> -> vector<16x256xf32>
    %51 = arith.addf %46, %50 : vector<16x256xf32>
    %52 = vector.broadcast %6 : vector<1x256xf32> to vector<16x256xf32>
    %53 = arith.addf %51, %52 : vector<16x256xf32>
    %54 = vector.extract_strided_slice %53 {offsets = [0, 0], sizes = [16, 128], strides = [1, 1]} : vector<16x256xf32> to vector<16x128xf32>
    %55 = vector.extract_strided_slice %53 {offsets = [0, 128], sizes = [16, 128], strides = [1, 1]} : vector<16x256xf32> to vector<16x128xf32>
    %cst_26 = arith.constant dense<0.000000e+00> : vector<128xf32>
    %56 = vector.multi_reduction <add>, %54, %cst_26 [0] : vector<16x128xf32> to vector<128xf32>
    %57 = vector.shape_cast %56 : vector<128xf32> to vector<1x128xf32>
    %58 = arith.addf %31, %57 : vector<1x128xf32>
    %59 = arith.mulf %54, %54 : vector<16x128xf32>
    %cst_27 = arith.constant dense<0.000000e+00> : vector<128xf32>
    %60 = vector.multi_reduction <add>, %59, %cst_27 [0] : vector<16x128xf32> to vector<128xf32>
    %61 = vector.shape_cast %60 : vector<128xf32> to vector<1x128xf32>
    %62 = arith.addf %35, %61 : vector<1x128xf32>
    %c0_28 = arith.constant 0 : index
    %c0_29 = arith.constant 0 : index
    %63 = vector.load %arg7[%c0_28, %c0_29] : memref<128x128xf32, #tpu.memory_space<vmem>>, vector<128x128xf32>
    %cst_30 = arith.constant dense<0.000000e+00> : vector<1x128xf32>
    %64 = tpu.matmul %58, %63, %cst_30 {dimension_numbers = #tpu.dot_dimension_numbers<[1], [0], [0], [1], [0, 0, 1, 1], [], []>, precision = #tpu.contract_precision<fp32>} : vector<1x128xf32>, vector<128x128xf32>, vector<1x128xf32> -> vector<1x128xf32>
    %c0_31 = arith.constant 0 : index
    %c0_32 = arith.constant 0 : index
    %65 = vector.load %arg7[%c0_31, %c0_32] : memref<128x128xf32, #tpu.memory_space<vmem>>, vector<128x128xf32>
    %cst_33 = arith.constant dense<0.000000e+00> : vector<1x128xf32>
    %66 = tpu.matmul %62, %65, %cst_33 {dimension_numbers = #tpu.dot_dimension_numbers<[1], [0], [0], [1], [0, 0, 1, 1], [], []>, precision = #tpu.contract_precision<fp32>} : vector<1x128xf32>, vector<128x128xf32>, vector<1x128xf32> -> vector<1x128xf32>
    %67 = arith.mulf %64, %64 : vector<1x128xf32>
    %68 = arith.subf %66, %67 : vector<1x128xf32>
    %cst_34 = arith.constant 9.99999974E-6 : f32
    %69 = vector.broadcast %cst_34 : f32 to vector<1x128xf32>
    %70 = arith.addf %68, %69 : vector<1x128xf32>
    %71 = math.rsqrt %70 : vector<1x128xf32>
    %c0_35 = arith.constant 0 : index
    %c0_36 = arith.constant 0 : index
    %72 = vector.load %arg3[%c0_35, %c0_36] : memref<1x128xf32, #tpu.memory_space<vmem>>, vector<1x128xf32>
    %73 = arith.mulf %71, %72 : vector<1x128xf32>
    %c0_37 = arith.constant 0 : index
    %c0_38 = arith.constant 0 : index
    %74 = vector.load %arg4[%c0_37, %c0_38] : memref<1x128xf32, #tpu.memory_space<vmem>>, vector<1x128xf32>
    %75 = arith.mulf %64, %73 : vector<1x128xf32>
    %76 = arith.subf %74, %75 : vector<1x128xf32>
    %c0_39 = arith.constant 0 : index
    %c0_40 = arith.constant 0 : index
    %77 = vector.load %arg6[%c0_39, %c0_40] : memref<1x128xf32, #tpu.memory_space<vmem>>, vector<1x128xf32>
    %78 = vector.broadcast %73 : vector<1x128xf32> to vector<16x128xf32>
    %79 = arith.mulf %27, %78 : vector<16x128xf32>
    %80 = vector.broadcast %76 : vector<1x128xf32> to vector<16x128xf32>
    %81 = arith.addf %79, %80 : vector<16x128xf32>
    %cst_41 = arith.constant 0.000000e+00 : f32
    %82 = vector.broadcast %cst_41 : f32 to vector<16x128xf32>
    %83 = arith.maximumf %81, %82 : vector<16x128xf32>
    %c1_42 = arith.constant 1 : index
    %c0_43 = arith.constant 0 : index
    %84 = vector.load %arg9[%c1_42, %c0_43] : memref<18x128xf32, #tpu.memory_space<vmem>>, vector<16x128xf32>
    tpu.vector_store %arg9[%c1_42, %c0_43], %83 {strides = array<i32>} : memref<18x128xf32, #tpu.memory_space<vmem>>, vector<16x128xf32>,
    %c0_44 = arith.constant 0 : index
    %c0_45 = arith.constant 0 : index
    %85 = vector.load %arg9[%c0_44, %c0_45] : memref<18x128xf32, #tpu.memory_space<vmem>>, vector<18x128xf32>
    %86 = vector.broadcast %77 : vector<1x128xf32> to vector<16x128xf32>
    %87 = arith.addf %28, %86 : vector<16x128xf32>
    %88 = vector.extract_strided_slice %85 {offsets = [0, 0], sizes = [16, 128], strides = [1, 1]} : vector<18x128xf32> to vector<16x128xf32>
    %89 = vector.extract_strided_slice %5 {offsets = [0, 0, 0], sizes = [1, 128, 128], strides = [1, 1, 1]} : vector<3x128x128xf32> to vector<1x128x128xf32>
    %90 = vector.shape_cast %89 : vector<1x128x128xf32> to vector<128x128xf32>
    %cst_46 = arith.constant dense<0.000000e+00> : vector<16x128xf32>
    %91 = tpu.matmul %88, %90, %cst_46 {dimension_numbers = #tpu.dot_dimension_numbers<[1], [0], [0], [1], [0, 0, 1, 1], [], []>} : vector<16x128xf32>, vector<128x128xf32>, vector<16x128xf32> -> vector<16x128xf32>
    %92 = arith.addf %87, %91 : vector<16x128xf32>
    %93 = vector.extract_strided_slice %85 {offsets = [1, 0], sizes = [16, 128], strides = [1, 1]} : vector<18x128xf32> to vector<16x128xf32>
    %94 = vector.extract_strided_slice %5 {offsets = [1, 0, 0], sizes = [1, 128, 128], strides = [1, 1, 1]} : vector<3x128x128xf32> to vector<1x128x128xf32>
    %95 = vector.shape_cast %94 : vector<1x128x128xf32> to vector<128x128xf32>
    %cst_47 = arith.constant dense<0.000000e+00> : vector<16x128xf32>
    %96 = tpu.matmul %93, %95, %cst_47 {dimension_numbers = #tpu.dot_dimension_numbers<[1], [0], [0], [1], [0, 0, 1, 1], [], []>} : vector<16x128xf32>, vector<128x128xf32>, vector<16x128xf32> -> vector<16x128xf32>
    %97 = arith.addf %92, %96 : vector<16x128xf32>
    %98 = vector.extract_strided_slice %85 {offsets = [2, 0], sizes = [16, 128], strides = [1, 1]} : vector<18x128xf32> to vector<16x128xf32>
    %99 = vector.extract_strided_slice %5 {offsets = [2, 0, 0], sizes = [1, 128, 128], strides = [1, 1, 1]} : vector<3x128x128xf32> to vector<1x128x128xf32>
    %100 = vector.shape_cast %99 : vector<1x128x128xf32> to vector<128x128xf32>
    %cst_48 = arith.constant dense<0.000000e+00> : vector<16x128xf32>
    %101 = tpu.matmul %98, %100, %cst_48 {dimension_numbers = #tpu.dot_dimension_numbers<[1], [0], [0], [1], [0, 0, 1, 1], [], []>} : vector<16x128xf32>, vector<128x128xf32>, vector<16x128xf32> -> vector<16x128xf32>
    %102 = arith.addf %97, %101 : vector<16x128xf32>
    %c0_49 = arith.constant 0 : index
    %c0_50 = arith.constant 0 : index
    %c0_51 = arith.constant 0 : index
    %103 = vector.load %arg8[%c0_49, %c0_50, %c0_51] : memref<2x16x128xf32, #tpu.memory_space<vmem>>, vector<1x16x128xf32>
    %104 = vector.shape_cast %103 : vector<1x16x128xf32> to vector<16x128xf32>
    %105 = vector.shape_cast %102 : vector<16x128xf32> to vector<1x16x128xf32>
    tpu.vector_store %arg8[%c0_49, %c0_50, %c0_51], %105 {strides = array<i32>} : memref<2x16x128xf32, #tpu.memory_space<vmem>>, vector<1x16x128xf32>,
    %106 = vector.broadcast %73 : vector<1x128xf32> to vector<16x128xf32>
    %107 = arith.mulf %54, %106 : vector<16x128xf32>
    %108 = vector.broadcast %76 : vector<1x128xf32> to vector<16x128xf32>
    %109 = arith.addf %107, %108 : vector<16x128xf32>
    %cst_52 = arith.constant 0.000000e+00 : f32
    %110 = vector.broadcast %cst_52 : f32 to vector<16x128xf32>
    %111 = arith.maximumf %109, %110 : vector<16x128xf32>
    %c1_53 = arith.constant 1 : index
    %c0_54 = arith.constant 0 : index
    %112 = vector.load %arg9[%c1_53, %c0_54] : memref<18x128xf32, #tpu.memory_space<vmem>>, vector<16x128xf32>
    tpu.vector_store %arg9[%c1_53, %c0_54], %111 {strides = array<i32>} : memref<18x128xf32, #tpu.memory_space<vmem>>, vector<16x128xf32>,
    %c0_55 = arith.constant 0 : index
    %c0_56 = arith.constant 0 : index
    %113 = vector.load %arg9[%c0_55, %c0_56] : memref<18x128xf32, #tpu.memory_space<vmem>>, vector<18x128xf32>
    %114 = vector.broadcast %77 : vector<1x128xf32> to vector<16x128xf32>
    %115 = arith.addf %55, %114 : vector<16x128xf32>
    %116 = vector.extract_strided_slice %113 {offsets = [0, 0], sizes = [16, 128], strides = [1, 1]} : vector<18x128xf32> to vector<16x128xf32>
    %117 = vector.extract_strided_slice %5 {offsets = [0, 0, 0], sizes = [1, 128, 128], strides = [1, 1, 1]} : vector<3x128x128xf32> to vector<1x128x128xf32>
    %118 = vector.shape_cast %117 : vector<1x128x128xf32> to vector<128x128xf32>
    %cst_57 = arith.constant dense<0.000000e+00> : vector<16x128xf32>
    %119 = tpu.matmul %116, %118, %cst_57 {dimension_numbers = #tpu.dot_dimension_numbers<[1], [0], [0], [1], [0, 0, 1, 1], [], []>} : vector<16x128xf32>, vector<128x128xf32>, vector<16x128xf32> -> vector<16x128xf32>
    %120 = arith.addf %115, %119 : vector<16x128xf32>
    %121 = vector.extract_strided_slice %113 {offsets = [1, 0], sizes = [16, 128], strides = [1, 1]} : vector<18x128xf32> to vector<16x128xf32>
    %122 = vector.extract_strided_slice %5 {offsets = [1, 0, 0], sizes = [1, 128, 128], strides = [1, 1, 1]} : vector<3x128x128xf32> to vector<1x128x128xf32>
    %123 = vector.shape_cast %122 : vector<1x128x128xf32> to vector<128x128xf32>
    %cst_58 = arith.constant dense<0.000000e+00> : vector<16x128xf32>
    %124 = tpu.matmul %121, %123, %cst_58 {dimension_numbers = #tpu.dot_dimension_numbers<[1], [0], [0], [1], [0, 0, 1, 1], [], []>} : vector<16x128xf32>, vector<128x128xf32>, vector<16x128xf32> -> vector<16x128xf32>
    %125 = arith.addf %120, %124 : vector<16x128xf32>
    %126 = vector.extract_strided_slice %113 {offsets = [2, 0], sizes = [16, 128], strides = [1, 1]} : vector<18x128xf32> to vector<16x128xf32>
    %127 = vector.extract_strided_slice %5 {offsets = [2, 0, 0], sizes = [1, 128, 128], strides = [1, 1, 1]} : vector<3x128x128xf32> to vector<1x128x128xf32>
    %128 = vector.shape_cast %127 : vector<1x128x128xf32> to vector<128x128xf32>
    %cst_59 = arith.constant dense<0.000000e+00> : vector<16x128xf32>
    %129 = tpu.matmul %126, %128, %cst_59 {dimension_numbers = #tpu.dot_dimension_numbers<[1], [0], [0], [1], [0, 0, 1, 1], [], []>} : vector<16x128xf32>, vector<128x128xf32>, vector<16x128xf32> -> vector<16x128xf32>
    %130 = arith.addf %125, %129 : vector<16x128xf32>
    %c1_60 = arith.constant 1 : index
    %c0_61 = arith.constant 0 : index
    %c0_62 = arith.constant 0 : index
    %131 = vector.load %arg8[%c1_60, %c0_61, %c0_62] : memref<2x16x128xf32, #tpu.memory_space<vmem>>, vector<1x16x128xf32>
    %132 = vector.shape_cast %131 : vector<1x16x128xf32> to vector<16x128xf32>
    %133 = vector.shape_cast %130 : vector<16x128xf32> to vector<1x16x128xf32>
    tpu.vector_store %arg8[%c1_60, %c0_61, %c0_62], %133 {strides = array<i32>} : memref<2x16x128xf32, #tpu.memory_space<vmem>>, vector<1x16x128xf32>,
    return
  }
}

</mosaic_0001>

<bundles_post_ra>
// kernel: tile.28
= control target key start
LH: loop header
LB: loop body
LE: loop exit
PB: predicated region body
PF: predicated region fallthrough
CT: control target
= control target key end

     0   :  { %s28_s0 = inlined_call_operand.vmem [shape: f32[8], index: 0, kind: input, shape index: {}]   ;;  %s29_s1 = inlined_call_operand.vmem [shape: f32[16,8], index: 1, kind: output, shape index: {}]  }
   0x1   :  { %v4_v0 = vld [vmem:[%s28_s0] ss:$0 sm:$0xff] }
   0x2   :  { %5 = vst [vmem:[%s29_s1] sm:$0xff] %v4_v0  ;;  %8 = vst [vmem:[%s29_s1 + $0x8] sm:$0xff] %v4_v0 }

// kernel: tile.29
= control target key start
LH: loop header
LB: loop body
LE: loop exit
PB: predicated region body
PF: predicated region fallthrough
CT: control target
= control target key end

     0   :  { %s133_s10 = smov 120   ;;  %s134_s11 = smov 104   ;;  %vm3_vm0 = vcmask 64512   ;;  %vm9_vm1 = vcmask 1048512   ;;  %vm15_vm2 = vcmask 982912   ;;  %vm21_vm3 = vcmask 917312   ;;  %s209_s0 = inlined_call_operand.vmem [shape: f32[16,8], index: 0, kind: input, shape index: {}]   ;;  %s210_s1 = inlined_call_operand.vmem [shape: f32[1,128], index: 1, kind: output, shape index: {}]  }
   0x1   :  { %v103_v0 = vld [vmem:[%s209_s0 + $0xf] sm:$0x1]   ;;  %v105_v1 = vld [vmem:[%s209_s0 + $0xd] sm:$0x1]   ;;  %v104_v2 = vld [vmem:[%s209_s0 + $0xe] sm:$0x1]  }
   0x2   :  { %7 = vrot.lane.b32.xlu0 %v103_v0, %s133_s10  ;;  %19 = vrot.lane.b32.xlu1 %v105_v1, %s134_s11  ;;  %v106_v3 = vld [vmem:[%s209_s0 + $0xc] sm:$0x1]   ;;  %s135_s16 = smov 112   ;;  %s136_s17 = smov 96   ;;  %v107_v4 = vld [vmem:[%s209_s0 + $0xb] sm:$0x1]  }
   0x3   :  { %v108_v5 = vld [vmem:[%s209_s0 + $0xa] sm:$0x1]   ;;  %v2_v6 = vld [vmem:[%s209_s0] sm:$0x1]   ;;  %s137_s24 = smov 88   ;;  %s138_s25 = smov 80  }
   0x4   :  { %4 = vst.msk [vmem:[#allocation0] sm:$0x1] %vm3_vm0, %v2_v6   ;;  %v109_v7 = vld [vmem:[%s209_s0 + $0x9] sm:$0x1]   ;;  %v110_v8 = vld [vmem:[%s209_s0 + $0x8] sm:$0x1]  }
   0x5   :  { %s139_s30 = smov 72   ;;  %s140_s2 = smov 64   ;;  %v111_v9 = vld [vmem:[%s209_s0 + $0x7] sm:$0x1]   ;;  %v112_v10 = vld [vmem:[%s209_s0 + $0x6] sm:$0x1]  }
   0x6   :  { %13 = vrot.lane.b32.xlu0 %v104_v2, %s135_s16  ;;  %25 = vrot.lane.b32.xlu1 %v106_v3, %s136_s17  ;;  %s141_s7 = smov 56   ;;  %s142_s8 = smov 48   ;;  %v113_v11 = vld [vmem:[%s209_s0 + $0x5] sm:$0x1]   ;;  %v114_v12 = vld [vmem:[%s209_s0 + $0x4] sm:$0x1]  }
   0x7   :  { %s143_s13 = smov 40   ;;  %s144_s14 = smov 32   ;;  %v115_v13 = vld [vmem:[%s209_s0 + $0x3] sm:$0x1]   ;;  %v116_v14 = vld [vmem:[%s209_s0 + $0x2] sm:$0x1]  }
   0x8   :  { %s145_s19 = smov 24   ;;  %s146_s20 = smov 16   ;;  %v117_v15 = vld [vmem:[%s209_s0 + $0x1] sm:$0x1]   ;;  %vm27_vm4 = vcmask 851712   ;;  %vm33_vm5 = vcmask 786112  }
   0x9   :  { %s147_s0 = smov 8   ;;  %vm39_vm6 = vcmask 720512   ;;  %vm45_vm7 = vcmask 654912   ;;  %vm51_vm8 = vcmask 589312   ;;  %vm57_vm9 = vcmask 523712  }
   0xa   :  { %31 = vrot.lane.b32.xlu0 %v107_v4, %s137_s24  ;;  %37 = vrot.lane.b32.xlu1 %v108_v5, %s138_s25  ;;  %vm63_vm10 = vcmask 458112   ;;  %vm69_vm11 = vcmask 392512   ;;  %vm75_vm12 = vcmask 326912   ;;  %vm81_vm13 = vcmask 261312  }
   0xb   :  { %vm87_vm14 = vcmask 195712   ;;  %vm93_vm15 = vcmask 130112  }
   0xe   :  { %43 = vrot.lane.b32.xlu0 %v109_v7, %s139_s30  ;;  %49 = vrot.lane.b32.xlu1 %v110_v8, %s140_s2 }
  0x12   :  { %55 = vrot.lane.b32.xlu0 %v111_v9, %s141_s7  ;;  %61 = vrot.lane.b32.xlu1 %v112_v10, %s142_s8 }
  0x16   :  { %67 = vrot.lane.b32.xlu0 %v113_v11, %s143_s13  ;;  %73 = vrot.lane.b32.xlu1 %v114_v12, %s144_s14 }
  0x1a   :  { %79 = vrot.lane.b32.xlu0 %v115_v13, %s145_s19  ;;  %85 = vrot.lane.b32.xlu1 %v116_v14, %s146_s20 }
  0x1e   :  { %91 = vrot.lane.b32.xlu0 %v117_v15, %s147_s0 }
  0x74   :  { %v8_v16 = vpop.permute.xlu0 %7   ;;  %v20_v17 = vpop.permute.xlu1 %19  }
  0x75   :  { %10 = vst.msk [vmem:[#allocation0] sm:$0x1] %vm9_vm1, %v8_v16  }
  0x78   :  { %v14_v18 = vpop.permute.xlu0 %13   ;;  %v26_v19 = vpop.permute.xlu1 %25  }
  0x79   :  { %16 = vst.msk [vmem:[#allocation0] sm:$0x1] %vm15_vm2, %v14_v18  }
  0x7a   :  { %22 = vst.msk [vmem:[#allocation0] sm:$0x1] %vm21_vm3, %v20_v17  }
  0x7b   :  { %28 = vst.msk [vmem:[#allocation0] sm:$0x1] %vm27_vm4, %v26_v19  }
  0x7c   :  { %v32_v20 = vpop.permute.xlu0 %31   ;;  %v38_v21 = vpop.permute.xlu1 %37  }
  0x7d   :  { %34 = vst.msk [vmem:[#allocation0] sm:$0x1] %vm33_vm5, %v32_v20  }
  0x7e   :  { %40 = vst.msk [vmem:[#allocation0] sm:$0x1] %vm39_vm6, %v38_v21  }
  0x80   :  { %v44_v22 = vpop.permute.xlu0 %43   ;;  %v50_v23 = vpop.permute.xlu1 %49  }
  0x81   :  { %46 = vst.msk [vmem:[#allocation0] sm:$0x1] %vm45_vm7, %v44_v22  }
  0x82   :  { %52 = vst.msk [vmem:[#allocation0] sm:$0x1] %vm51_vm8, %v50_v23  }
  0x84   :  { %v56_v24 = vpop.permute.xlu0 %55   ;;  %v62_v25 = vpop.permute.xlu1 %61  }
  0x85   :  { %58 = vst.msk [vmem:[#allocation0] sm:$0x1] %vm57_vm9, %v56_v24  }
  0x86   :  { %64 = vst.msk [vmem:[#allocation0] sm:$0x1] %vm63_vm10, %v62_v25  }
  0x88   :  { %v68_v26 = vpop.permute.xlu0 %67   ;;  %v74_v27 = vpop.permute.xlu1 %73  }
  0x89   :  { %70 = vst.msk [vmem:[#allocation0] sm:$0x1] %vm69_vm11, %v68_v26  }
  0x8a   :  { %76 = vst.msk [vmem:[#allocation0] sm:$0x1] %vm75_vm12, %v74_v27  }
  0x8c   :  { %v80_v28 = vpop.permute.xlu0 %79   ;;  %v86_v29 = vpop.permute.xlu1 %85  }
  0x8d   :  { %82 = vst.msk [vmem:[#allocation0] sm:$0x1] %vm81_vm13, %v80_v28  }
  0x8e   :  { %88 = vst.msk [vmem:[#allocation0] sm:$0x1] %vm87_vm14, %v86_v29  }
  0x90   :  { %v92_v30 = vpop.permute.xlu0 %91  }
  0x91   :  { %94 = vst.msk [vmem:[#allocation0] sm:$0x1] %vm93_vm15, %v92_v30  }
  0x98   :  { %v99_v31 = vld [vmem:[#allocation0] sm:$0x1] }
  0x99   :  { %102 = vst [vmem:[%s210_s1] sm:$0x1] %v99_v31 }

// kernel: stem_forward.1
= control target key start
LH: loop header
LB: loop body
LE: loop exit
PB: predicated region body
PF: predicated region fallthrough
CT: control target
= control target key end

     0   :  { %v5239_v3 = vmov 0.0   ;;  %vm134_vm0 = vcmask 1046528   ;;  %vm140_vm1 = vcmask 523264   ;;  %vm303_vm2 = vcmask 1045504   ;;  %s5204_s1 = inlined_call_operand.vmem [shape: f32[3,64,256], index: 1, kind: input, shape index: {}]   ;;  %s5205_s0 = inlined_call_operand.vmem [shape: f32[2,18,64], index: 0, kind: input, shape index: {}]   ;;  %s5206_s2 = inlined_call_operand.vmem [shape: f32[1,256], index: 2, kind: input, shape index: {}]   ;;  %s5207_s7 = inlined_call_operand.vmem [shape: f32[128,128], index: 7, kind: input, shape index: {}]   ;;  %s5208_s5 = inlined_call_operand.vmem [shape: f32[3,128,128], index: 5, kind: input, shape index: {}]   ;;  %s5209_s3 = inlined_call_operand.vmem [shape: f32[1,128], index: 3, kind: input, shape index: {}]   ;;  %s5210_s4 = inlined_call_operand.vmem [shape: f32[1,128], index: 4, kind: input, shape index: {}]   ;;  %s5211_s6 = inlined_call_operand.vmem [shape: f32[1,128], index: 6, kind: input, shape index: {}]   ;;  %s5212_s8 = inlined_call_operand.vmem [shape: f32[2,16,128], index: 8, kind: output, shape index: {}]  }
   0x1   :  { %v3582_v0 = vld [vmem:[%s5204_s1 + $0xf8] sm:$0xff]  ;;  %v3592_v2 = vld [vmem:[%s5204_s1 + $0xf0] sm:$0xff]  ;;  %209 = vmatprep.mubr.f32.mxu0 %v5239_v3  ;;  %29 = vst [vmem:[#allocation2] sm:$0x1] %v5239_v3  ;;  %30 = vst [vmem:[#allocation2 + $0x11] sm:$0x1] %v5239_v3  ;;  %290 = vmatprep.mubr.f32.mxu1 %v5239_v3 }
   0x2   :  { %v3587_v1 = vld [vmem:[%s5204_s1 + $0x78] sm:$0xff]  ;;  %161 = vmatprep.subr.mxu0 %v3582_v0  ;;  %v3603_v4 = vld [vmem:[%s5204_s1 + $0x70] sm:$0xff]  ;;  %v3608_v5 = vld [vmem:[%s5204_s1 + $0xe8] sm:$0xff]  ;;  %vm3533_vm3 = vmmov 0  }
   0x3   :  { %242 = vmatprep.subr.mxu1 %v3587_v1  ;;  %v3613_v6 = vld [vmem:[%s5204_s1 + $0x68] sm:$0xff]  ;;  %162 = vmatpush1.msra.mxu0 %v3592_v2  ;;  %v3620_v7 = vld [vmem:[%s5204_s1 + $0xe0] sm:$0xff]  ;;  %v3630_v9 = vld [vmem:[%s5204_s1 + $0xd8] sm:$0xff] }
   0x4   :  { %243 = vmatpush1.msra.mxu1 %v3603_v4  ;;  %v3625_v8 = vld [vmem:[%s5204_s1 + $0x60] sm:$0xff]  ;;  %163 = vmatprep.subr.mxu0 %v3608_v5  ;;  %v3637_v10 = vld [vmem:[%s5204_s1 + $0x58] sm:$0xff]  ;;  %v3642_v11 = vld [vmem:[%s5204_s1 + $0xd0] sm:$0xff] }
   0x5   :  { %244 = vmatprep.subr.mxu1 %v3613_v6  ;;  %v3647_v12 = vld [vmem:[%s5204_s1 + $0x50] sm:$0xff]  ;;  %164 = vmatpush1.msra.mxu0 %v3620_v7  ;;  %v3654_v13 = vld [vmem:[%s5204_s1 + $0xc8] sm:$0xff]  ;;  %v3666_v15 = vld [vmem:[%s5204_s1 + $0xc0] sm:$0xff] }
   0x6   :  { %245 = vmatpush1.msra.mxu1 %v3625_v8  ;;  %v3659_v14 = vld [vmem:[%s5204_s1 + $0x48] sm:$0xff]  ;;  %165 = vmatprep.subr.mxu0 %v3630_v9  ;;  %v3671_v16 = vld [vmem:[%s5204_s1 + $0x40] sm:$0xff]  ;;  %v3678_v17 = vld [vmem:[%s5204_s1 + $0xb8] sm:$0xff] }
   0x7   :  { %246 = vmatprep.subr.mxu1 %v3637_v10  ;;  %166 = vmatpush1.msra.mxu0 %v3642_v11  ;;  %v3683_v18 = vld [vmem:[%s5204_s1 + $0x38] sm:$0xff]  ;;  %v3690_v19 = vld [vmem:[%s5204_s1 + $0xb0] sm:$0xff]  ;;  %v3702_v21 = vld [vmem:[%s5204_s1 + $0xa8] sm:$0xff] }
   0x8   :  { %247 = vmatpush1.msra.mxu1 %v3647_v12  ;;  %167 = vmatprep.subr.mxu0 %v3654_v13  ;;  %v3695_v20 = vld [vmem:[%s5204_s1 + $0x30] sm:$0xff]  ;;  %v3707_v22 = vld [vmem:[%s5204_s1 + $0x28] sm:$0xff]  ;;  %v3714_v23 = vld [vmem:[%s5204_s1 + $0xa0] sm:$0xff] }
   0x9   :  { %248 = vmatprep.subr.mxu1 %v3659_v14  ;;  %168 = vmatpush1.msra.mxu0 %v3666_v15  ;;  %v3719_v24 = vld [vmem:[%s5204_s1 + $0x20] sm:$0xff]  ;;  %v3726_v25 = vld [vmem:[%s5204_s1 + $0x98] sm:$0xff]  ;;  %v3743_v28 = vld [vmem:[%s5204_s1 + $0x90] sm:$0xff] }
   0xa   :  { %249 = vmatpush1.msra.mxu1 %v3671_v16  ;;  %169 = vmatprep.subr.mxu0 %v3678_v17  ;;  %v3731_v26 = vld [vmem:[%s5204_s1 + $0x18] sm:$0xff]  ;;  %v3736_v27 = vld [vmem:[%s5205_s0] sm:$0xff]  ;;  %v3748_v29 = vld [vmem:[%s5204_s1 + $0x10] sm:$0xff] }
   0xb   :  { %250 = vmatprep.subr.mxu1 %v3683_v18  ;;  %170 = vmatpush1.msra.mxu0 %v3690_v19  ;;  %v3753_v30 = vld [vmem:[%s5205_s0 + $0x8] sm:$0xff]  ;;  %v135_v31 = vrot.slane %v3736_v27, 1  ;;  %v3774_v35 = vld [vmem:[%s5204_s1 + $0x80] sm:$0xff]  ;;  %v3789_v38 = vld [vmem:[%s5204_s1 + $0x178] sm:$0xff]  ;;  %v304_v55 = vrot.slane %v3736_v27, 2 }
   0xc   :  { %251 = vmatpush1.msra.mxu1 %v3695_v20  ;;  %171 = vmatprep.subr.mxu0 %v3702_v21  ;;  %v3761_v32 = vld [vmem:[%s5204_s1 + $0x88] sm:$0xff]  ;;  %v136_v34 = vrot.slane %v3753_v30, 1  ;;  %v3779_v36 = vld [vmem:[%s5204_s1] sm:$0xff]  ;;  %v3796_v39 = vld [vmem:[%s5204_s1 + $0x170] sm:$0xff]  ;;  %v305_v56 = vrot.slane %v3753_v30, 2 }
   0xd   :  { %252 = vmatprep.subr.mxu1 %v3707_v22  ;;  %172 = vmatpush1.msra.mxu0 %v3714_v23  ;;  %v3766_v33 = vld [vmem:[%s5204_s1 + $0x8] sm:$0xff]  ;;  %v3811_v41 = vld [vmem:[%s5204_s1 + $0x160] sm:$0xff]  ;;  %v3818_v42 = vld [vmem:[%s5204_s1 + $0x158] sm:$0xff] }
   0xe   :  { %253 = vmatpush1.msra.mxu1 %v3719_v24  ;;  %173 = vmatprep.subr.mxu0 %v3726_v25  ;;  %v137_v37 = vsel %vm134_vm0, %v135_v31, %v136_v34  ;;  %v3804_v40 = vld [vmem:[%s5204_s1 + $0x168] sm:$0xff]  ;;  %v3825_v43 = vld [vmem:[%s5204_s1 + $0x150] sm:$0xff]  ;;  %v3844_v46 = vld [vmem:[%s5204_s1 + $0x140] sm:$0xff]  ;;  %v306_v63 = vsel %vm303_vm2, %v304_v55, %v305_v56 }
   0xf   :  { %254 = vmatprep.subr.mxu1 %v3731_v26  ;;  %174 = vmatpush1.msra.mxu0 %v3743_v28  ;;  %v3830_v44 = vld [vmem:[%s5205_s0 + $0x10] sm:$0x3]  ;;  %v3837_v45 = vld [vmem:[%s5204_s1 + $0x148] sm:$0xff]  ;;  %v3851_v47 = vld [vmem:[%s5204_s1 + $0x138] sm:$0xff] }
  0x10   :  { %255 = vmatpush1.msra.mxu1 %v3748_v29  ;;  %175 = vmatprep.subr.mxu0 %v3761_v32  ;;  %v138_v48 = vrot.slane %v3830_v44, 1  ;;  %v3859_v49 = vld [vmem:[%s5204_s1 + $0x130] sm:$0xff]  ;;  %v3868_v50 = vld [vmem:[%s5204_s1 + $0x128] sm:$0xff]  ;;  %v3878_v52 = vld [vmem:[%s5204_s1 + $0x120] sm:$0xff] }
  0x11   :  { %256 = vmatprep.subr.mxu1 %v3766_v33  ;;  %176 = vmatpush1.msra.mxu0 %v3774_v35  ;;  %v3883_v53 = vld [vmem:[%s5205_s0 + $0x18] sm:$0xff]  ;;  %v3888_v54 = vld [vmem:[%s5205_s0 + $0x20] sm:$0xff]  ;;  %v65_v58 = vld [vmem:[%s5204_s1 + $0x110] sm:$0xff] }
  0x12   :  { %257 = vmatpush1.msra.mxu1 %v3779_v36  ;;  %2568 = vmatmul.mubr.msk.f32.vlgmr.msra.gmra.mxu0 %vm140_vm1, %v137_v37  ;;  %v139_v51 = vsel %vm134_vm0, %v136_v34, %v138_v48  ;;  %v66_v57 = vld [vmem:[%s5204_s1 + $0x118] sm:$0xff]  ;;  %v64_v59 = vld [vmem:[%s5204_s1 + $0x108] sm:$0xff]  ;;  %v434_v60 = vrot.slane %v3883_v53, 1  ;;  %v435_v61 = vrot.slane %v3888_v54, 1  ;;  %v63_v62 = vld [vmem:[%s5204_s1 + $0x100] sm:$0xff] }
  0x13   :  { %2570 = vmatmul.mubr.msk.f32.vlgmr.msra.gmra.mxu1 %vm140_vm1, %v3736_v27  ;;  %329 = vmatprep.subr.mxu0 %v3789_v38  ;;  %v724_v31 = vld [vmem:[%s5207_s7 + $0x58] sm:$0xff]  ;;  %v723_v37 = vld [vmem:[%s5207_s7 + $0x50] sm:$0xff] }
  0x14   :  { %459 = vmatprep.subr.mxu1 %v3582_v0  ;;  %330 = vmatpush1.msra.mxu0 %v3796_v39  ;;  %v436_v0 = vsel %vm134_vm0, %v434_v60, %v435_v61  ;;  %v720_v55 = vld [vmem:[%s5207_s7 + $0x38] sm:$0xff] }
  0x15   :  { %460 = vmatpush1.msra.mxu1 %v3592_v2  ;;  %331 = vmatprep.subr.mxu0 %v3804_v40  ;;  %v307_v2 = vrot.slane %v3830_v44, 2 }
  0x16   :  { %461 = vmatprep.subr.mxu1 %v3608_v5  ;;  %332 = vmatpush1.msra.mxu0 %v3811_v41 }
  0x17   :  { %462 = vmatpush1.msra.mxu1 %v3620_v7  ;;  %333 = vmatprep.subr.mxu0 %v3818_v42  ;;  %v308_v5 = vsel %vm303_vm2, %v305_v56, %v307_v2  ;;  %v601_v7 = vrot.slane %v3883_v53, 2 }
  0x18   :  { %463 = vmatprep.subr.mxu1 %v3630_v9  ;;  %334 = vmatpush1.msra.mxu0 %v3825_v43 }
  0x19   :  { %464 = vmatpush1.msra.mxu1 %v3642_v11  ;;  %335 = vmatprep.subr.mxu0 %v3837_v45 }
  0x1a   :  { %465 = vmatprep.subr.mxu1 %v3654_v13  ;;  %336 = vmatpush1.msra.mxu0 %v3844_v46 }
  0x1b   :  { %466 = vmatpush1.msra.mxu1 %v3666_v15  ;;  %337 = vmatprep.subr.mxu0 %v3851_v47  ;;  %v3983_v15 = vld [vmem:[%s5206_s2] sm:$0x3] }
  0x1c   :  { %467 = vmatprep.subr.mxu1 %v3678_v17  ;;  %338 = vmatpush1.msra.mxu0 %v3859_v49  ;;  %v728_v17 = vld [vmem:[%s5207_s7 + $0x78] sm:$0xff] }
  0x1d   :  { %468 = vmatpush1.msra.mxu1 %v3690_v19  ;;  %215 = vmatprep.mubr.f32.mxu0 %v5239_v3  ;;  %v727_v19 = vld [vmem:[%s5207_s7 + $0x70] sm:$0xff] }
  0x1e   :  { %296 = vmatprep.mubr.f32.mxu1 %v5239_v3  ;;  %339 = vmatprep.subr.mxu0 %v3868_v50 }
  0x1f   :  { %469 = vmatprep.subr.mxu1 %v3702_v21  ;;  %2569 = vmatmul.mubr.msk.f32.gmra.mxu0 %vm140_vm1, %v139_v51  ;;  %v3999_v21 = vand.u32 4294901760, %v727_v19 }
  0x20   :  { %2571 = vmatmul.mubr.msk.f32.gmra.mxu1 %vm140_vm1, %v3753_v30  ;;  %340 = vmatpush1.msra.mxu0 %v3878_v52 }
  0x21   :  { %470 = vmatpush1.msra.mxu1 %v3714_v23  ;;  %341 = vmatprep.subr.mxu0 %v66_v57 }
  0x22   :  { %471 = vmatprep.subr.mxu1 %v3726_v25  ;;  %342 = vmatpush1.msra.mxu0 %v65_v58 }
  0x23   :  { %472 = vmatpush1.msra.mxu1 %v3743_v28  ;;  %343 = vmatprep.subr.mxu0 %v64_v59 }
  0x24   :  { %473 = vmatprep.subr.mxu1 %v3761_v32  ;;  %344 = vmatpush1.msra.mxu0 %v63_v62 }
  0x25   :  { %377 = vmatprep.mubr.f32.mxu0 %v5239_v3  ;;  %474 = vmatpush1.msra.mxu1 %v3774_v35 }
  0x26   :  { %2572 = vmatmul.mubr.msk.f32.vlgmr.msra.gmra.mxu0 %vm140_vm1, %v306_v63  ;;  %507 = vmatprep.mubr.f32.mxu1 %v5239_v3 }
  0x27   :  { %540 = vmatprep.subr.mxu0 %v3587_v1  ;;  %626 = vmatprep.subr.mxu1 %v3789_v38  ;;  %v2576_v1 = vld [vmem:[%s5205_s0 + $0x28] sm:$0x3] }
  0x28   :  { %2577 = vmatmul.mubr.msk.f32.vlgmr.msra.gmra.mxu1 %vm140_vm1, %v436_v0  ;;  %541 = vmatpush1.msra.mxu0 %v3603_v4  ;;  %v437_v4 = vrot.slane %v2576_v1, 1 }
  0x29   :  { %627 = vmatpush1.msra.mxu1 %v3796_v39  ;;  %542 = vmatprep.subr.mxu0 %v3613_v6 }
  0x2a   :  { %628 = vmatprep.subr.mxu1 %v3804_v40  ;;  %383 = vmatprep.mubr.f32.mxu0 %v5239_v3  ;;  %v438_v6 = vsel %vm134_vm0, %v435_v61, %v437_v4  ;;  %v719_v61 = vld [vmem:[%s5207_s7 + $0x30] sm:$0xff] }
  0x2b   :  { %543 = vmatpush1.msra.mxu0 %v3625_v8  ;;  %629 = vmatpush1.msra.mxu1 %v3811_v41  ;;  %v602_v8 = vrot.slane %v3888_v54, 2  ;;  %v4059_v41 = vand.u32 4294901760, %v723_v37 }
  0x2c   :  { %2573 = vmatmul.mubr.msk.f32.gmra.mxu0 %vm140_vm1, %v308_v5  ;;  %544 = vmatprep.subr.mxu0 %v3637_v10  ;;  %v604_v10 = vrot.slane %v2576_v1, 2  ;;  %v4138_v5 = vand.u32 4294901760, %v719_v61  ;;  %v718_v1 = vld [vmem:[%s5207_s7 + $0x28] sm:$0xff] }
  0x2d   :  { %630 = vmatprep.subr.mxu1 %v3818_v42  ;;  %545 = vmatpush1.msra.mxu0 %v3647_v12  ;;  %v603_v9 = vsel %vm303_vm2, %v601_v7, %v602_v8  ;;  %v395_v12 = vlaneseq }
  0x2e   :  { %631 = vmatpush1.msra.mxu1 %v3825_v43  ;;  %546 = vmatprep.subr.mxu0 %v3659_v14  ;;  %v605_v11 = vsel %vm303_vm2, %v602_v8, %v604_v10  ;;  %v722_v43 = vld [vmem:[%s5207_s7 + $0x48] sm:$0xff]  ;;  %v4152_v8 = vand.u32 4294901760, %v718_v1  ;;  %v717_v10 = vld [vmem:[%s5207_s7 + $0x20] sm:$0xff] }
  0x2f   :  { %632 = vmatprep.subr.mxu1 %v3837_v45  ;;  %547 = vmatpush1.msra.mxu0 %v3671_v16  ;;  %v3977_v13 = vshrl.u32 %v395_v12, 7 }
  0x30   :  { %633 = vmatpush1.msra.mxu1 %v3844_v46  ;;  %548 = vmatprep.subr.mxu0 %v3683_v18  ;;  %v3991_v18 = vand.u32 4294901760, %v728_v17  ;;  %v4075_v46 = vsub.f32 %v723_v37, %v4059_v41 }
  0x31   :  { %634 = vmatprep.subr.mxu1 %v3851_v47  ;;  %549 = vmatpush1.msra.mxu0 %v3695_v20  ;;  %v401_v14 = vsub.s32 1, %v3977_v13  ;;  %v4077_v47 = vand.u32 4294901760, %v722_v43 }
  0x32   :  { %635 = vmatpush1.msra.mxu1 %v3859_v49  ;;  %550 = vmatprep.subr.mxu0 %v3707_v22  ;;  %v3997_v20 = vsub.f32 %v728_v17, %v3991_v18  ;;  %v726_v22 = vld [vmem:[%s5207_s7 + $0x68] sm:$0xff]  ;;  %v721_v49 = vld [vmem:[%s5207_s7 + $0x40] sm:$0xff]  ;;  %v4092_v51 = vand.u32 4294901760, %v4075_v46  ;;  %v4171_v17 = vand.u32 4294901760, %v717_v10 }
  0x33   :  { %636 = vmatprep.subr.mxu1 %v3868_v50  ;;  %513 = vmatprep.mubr.f32.mxu1 %v5239_v3  ;;  %v3986_v16 = vrot.slane %v3983_v15, %v401_v14  ;;  %v4012_v25 = vand.u32 4294901760, %v726_v22  ;;  %v4169_v14 = vsub.f32 %v718_v1, %v4152_v8 }
  0x34   :  { %551 = vmatpush1.msra.mxu0 %v3719_v24  ;;  %637 = vmatpush1.msra.mxu1 %v3878_v52  ;;  %v4007_v23 = vand.u32 4294901760, %v3997_v20  ;;  %v4010_v24 = vsub.f32 %v727_v19, %v3999_v21  ;;  %5263 = vst [vmem:[#allocation7_spill] sm:$0xff] %v4092_v51  ;;  %v4095_v52 = vsub.f32 %v722_v43, %v4077_v47 }
  0x35   :  { %552 = vmatprep.subr.mxu0 %v3731_v26  ;;  %2578 = vmatmul.mubr.msk.f32.gmra.mxu1 %vm140_vm1, %v438_v6  ;;  %v725_v26 = vld [vmem:[%s5207_s7 + $0x60] sm:$0xff]  ;;  %v859_v56 = vsub.f32 %v4075_v46, %v4092_v51 }
  0x36   :  { %638 = vmatprep.subr.mxu1 %v66_v57  ;;  %553 = vmatpush1.msra.mxu0 %v3748_v29  ;;  %v824_v27 = vsub.f32 %v3997_v20, %v4007_v23  ;;  %v4022_v28 = vand.u32 4294901760, %v4010_v24  ;;  %v4025_v29 = vsub.f32 %v726_v22, %v4012_v25  ;;  %v4027_v30 = vand.u32 4294901760, %v725_v26  ;;  %v716_v22 = vld [vmem:[%s5207_s7 + $0x18] sm:$0xff] }
  0x37   :  { %639 = vmatpush1.msra.mxu1 %v65_v58  ;;  %554 = vmatprep.subr.mxu0 %v3766_v33  ;;  %v4111_v57 = vand.u32 4294901760, %v4095_v52 }
  0x38   :  { %640 = vmatprep.subr.mxu1 %v64_v59  ;;  %555 = vmatpush1.msra.mxu0 %v3779_v36  ;;  %v4034_v32 = vand.u32 4294901760, %v824_v27  ;;  %v831_v33 = vsub.f32 %v4010_v24, %v4022_v28  ;;  %v4039_v34 = vand.u32 4294901760, %v4025_v29  ;;  %v4042_v35 = vsub.f32 %v725_v26, %v4027_v30 }
  0x39   :  { %588 = vmatprep.mubr.f32.mxu0 %v5239_v3  ;;  %641 = vmatpush1.msra.mxu1 %v63_v62  ;;  %v4045_v36 = vand.u32 4294901760, %v724_v31  ;;  %5264 = vst [vmem:[#allocation8_spill] sm:$0xff] %v4111_v57  ;;  %v4116_v59 = vand.u32 4294901760, %v720_v55  ;;  %v4126_v62 = vand.u32 4294901760, %v859_v56  ;;  %v866_v63 = vsub.f32 %v4095_v52, %v4111_v57  ;;  %v714_v56 = vld [vmem:[%s5207_s7 + $0x8] sm:$0xff] }
  0x3a   :  { %674 = vmatprep.mubr.f32.mxu1 %v5239_v3  ;;  %2579 = vmatmul.mubr.msk.f32.vlgmr.msra.gmra.mxu0 %vm140_vm1, %v3883_v53  ;;  %5259 = vst [vmem:[#allocation3_spill] sm:$0xff] %v4034_v32  ;;  %v4052_v38 = vand.u32 4294901760, %v831_v33  ;;  %v838_v39 = vsub.f32 %v4025_v29, %v4039_v34  ;;  %v4057_v40 = vand.u32 4294901760, %v4042_v35  ;;  %v4097_v53 = vand.u32 4294901760, %v721_v49 }
  0x3b   :  { %2581 = vmatmul.mubr.msk.f32.vlgmr.msra.gmra.mxu1 %vm140_vm1, %v603_v9  ;;  %594 = vmatprep.mubr.f32.mxu0 %v5239_v3  ;;  %v4063_v42 = vsub.f32 %v724_v31, %v4045_v36  ;;  %5266 = vst [vmem:[#allocation10_spill] sm:$0xff] %v4126_v62  ;;  %v4134_v2 = vsub.f32 %v720_v55, %v4116_v59  ;;  %v4145_v4 = vand.u32 4294901760, %v866_v63  ;;  %v4186_v27 = vand.u32 4294901760, %v4169_v14 }
  0x3c   :  { %680 = vmatprep.mubr.f32.mxu1 %v5239_v3  ;;  %2933 = vmatprep.subr.mxu1 %v5239_v3  ;;  %5260 = vst [vmem:[#allocation4_spill] sm:$0xff] %v4052_v38  ;;  %v4070_v44 = vand.u32 4294901760, %v838_v39  ;;  %v845_v45 = vsub.f32 %v4042_v35, %v4057_v40  ;;  %v4114_v58 = vsub.f32 %v721_v49, %v4097_v53  ;;  %v4191_v33 = vand.u32 4294901760, %v716_v22  ;;  %v715_v39 = vld [vmem:[%s5207_s7 + $0x10] sm:$0xff] }
  0x3d   :  { %2898 = vmatprep.subr.mxu0 %v5239_v3  ;;  %2934 = vmatpush3.msra.mxu1 %v4034_v32  ;;  %v4082_v48 = vand.u32 4294901760, %v4063_v42  ;;  %5268 = vst [vmem:[#allocation12_spill] sm:$0xff] %v4145_v4  ;;  %v4150_v7 = vand.u32 4294901760, %v4134_v2  ;;  %v4157_v9 = vsub.f32 %v719_v61, %v4138_v5  ;;  %5273 = vst [vmem:[#allocation17_spill] sm:$0xff] %v4186_v27 }
  0x3e   :  { %2580 = vmatmul.mubr.msk.f32.gmra.mxu0 %vm140_vm1, %v3888_v54  ;;  %2935 = vmatprep.subr.mxu1 %v5239_v3  ;;  %5261 = vst [vmem:[#allocation5_spill] sm:$0xff] %v4070_v44  ;;  %v4089_v50 = vand.u32 4294901760, %v845_v45  ;;  %v4131_v0 = vand.u32 4294901760, %v4114_v58  ;;  %v4189_v31 = vsub.f32 %v717_v10, %v4171_v17  ;;  %v894_v43 = vsub.f32 %v4169_v14, %v4186_v27 }
  0x3f   :  { %2582 = vmatmul.mubr.msk.f32.gmra.mxu1 %vm140_vm1, %v605_v11  ;;  %2899 = vmatpush3.msra.mxu0 %v3991_v18  ;;  %v852_v54 = vsub.f32 %v4063_v42, %v4082_v48  ;;  %5269 = vst [vmem:[#allocation13_spill] sm:$0xff] %v4150_v7  ;;  %v880_v12 = vsub.f32 %v4134_v2, %v4150_v7  ;;  %v4176_v19 = vand.u32 4294901760, %v4157_v9  ;;  %v4233_v10 = vand.u32 4294901760, %v714_v56 }
  0x40   :  { %2900 = vmatprep.subr.mxu0 %v5239_v3  ;;  %2936 = vmatpush3.msra.mxu1 %v4052_v38  ;;  %5262 = vst [vmem:[#allocation6_spill] sm:$0xff] %v4089_v50  ;;  %5267 = vst [vmem:[#allocation11_spill] sm:$0xff] %v4131_v0  ;;  %v873_v6 = vsub.f32 %v4114_v58, %v4131_v0  ;;  %v4205_v45 = vand.u32 4294901760, %v4189_v31  ;;  %v4208_v49 = vsub.f32 %v716_v22, %v4191_v33 }
  0x41   :  { %2901 = vmatpush3.msra.mxu0 %v3999_v21  ;;  %2937 = vmatprep.subr.mxu1 %v5239_v3  ;;  %v4120_v60 = vand.u32 4294901760, %v852_v54  ;;  %5271 = vst [vmem:[#allocation15_spill] sm:$0xff] %v4176_v19  ;;  %v4183_v26 = vand.u32 4294901760, %v880_v12  ;;  %v887_v37 = vsub.f32 %v4157_v9, %v4176_v19  ;;  %v4210_v54 = vand.u32 4294901760, %v715_v39  ;;  %v713_v12 = vld [vmem:[%s5207_s7] sm:$0xff] }
  0x42   :  { %2902 = vmatprep.subr.mxu0 %v5239_v3  ;;  %2938 = vmatpush3.msra.mxu1 %v4070_v44  ;;  %v4164_v11 = vand.u32 4294901760, %v873_v6  ;;  %5274 = vst [vmem:[#allocation18_spill] sm:$0xff] %v4205_v45  ;;  %v4221_v61 = vand.u32 4294901760, %v894_v43  ;;  %v901_v63 = vsub.f32 %v4189_v31, %v4205_v45  ;;  %v4226_v1 = vand.u32 4294901760, %v4208_v49 }
  0x43   :  { %2903 = vmatpush3.msra.mxu0 %v4012_v25  ;;  %2939 = vmatprep.subr.mxu1 %v5239_v3  ;;  %5265 = vst [vmem:[#allocation9_spill] sm:$0xff] %v4120_v60  ;;  %5272 = vst [vmem:[#allocation16_spill] sm:$0xff] %v4183_v26  ;;  %v4214_v55 = vand.u32 4294901760, %v887_v37  ;;  %v4229_v6 = vsub.f32 %v715_v39, %v4210_v54  ;;  %v4247_v43 = vand.u32 4294901760, %v713_v12  ;;  %v4300_v27 = vsub.s32 0, %v3977_v13 }
  0x44   :  { %2904 = vmatprep.subr.mxu0 %v5239_v3  ;;  %2940 = vmatpush3.msra.mxu1 %v4089_v50  ;;  %5270 = vst [vmem:[#allocation14_spill] sm:$0xff] %v4164_v11  ;;  %5276 = vst [vmem:[#allocation20_spill] sm:$0xff] %v4221_v61  ;;  %v4240_v22 = vand.u32 4294901760, %v901_v63  ;;  %v908_v37 = vsub.f32 %v4208_v49, %v4226_v1 }
  0x45   :  { %2905 = vmatpush3.msra.mxu0 %v4027_v30  ;;  %2941 = vmatprep.subr.mxu1 %v5239_v3  ;;  %5275 = vst [vmem:[#allocation19_spill] sm:$0xff] %v4214_v55  ;;  %5277 = vst [vmem:[#allocation21_spill] sm:$0xff] %v4226_v1  ;;  %v4245_v39 = vand.u32 4294901760, %v4229_v6 }
  0x46   :  { %2906 = vmatprep.subr.mxu0 %v5239_v3  ;;  %2942 = vmatpush3.msra.mxu1 %v4120_v60  ;;  %5278 = vst [vmem:[#allocation22_spill] sm:$0xff] %v4240_v22  ;;  %v4256_v63 = vand.u32 4294901760, %v908_v37  ;;  %5287 = vst [vmem:[#allocation31_spill] sm:$0xff] %v4300_v27 }
  0x47   :  { %2907 = vmatpush3.msra.mxu0 %v4045_v36  ;;  %2943 = vmatprep.subr.mxu1 %v5239_v3  ;;  %5279 = vst [vmem:[#allocation23_spill] sm:$0xff] %v4245_v39 }
  0x48   :  { %2908 = vmatprep.subr.mxu0 %v5239_v3  ;;  %2944 = vmatpush3.msra.mxu1 %v4126_v62  ;;  %5280 = vst [vmem:[#allocation24_spill] sm:$0xff] %v4256_v63 }
  0x49   :  { %2909 = vmatpush3.msra.mxu0 %v4059_v41  ;;  %2945 = vmatprep.subr.mxu1 %v5239_v3 }
  0x4a   :  { %2910 = vmatprep.subr.mxu0 %v5239_v3  ;;  %2946 = vmatpush3.msra.mxu1 %v4145_v4 }
  0x4b   :  { %2911 = vmatpush3.msra.mxu0 %v4077_v47  ;;  %2947 = vmatprep.subr.mxu1 %v5239_v3 }
  0x4c   :  { %2912 = vmatprep.subr.mxu0 %v5239_v3  ;;  %2948 = vmatpush3.msra.mxu1 %v4164_v11  ;;  %v4261_v11 = vsub.f32 %v713_v12, %v4247_v43 }
  0x4d   :  { %2913 = vmatpush3.msra.mxu0 %v4097_v53  ;;  %2949 = vmatprep.subr.mxu1 %v5239_v3 }
  0x4e   :  { %2914 = vmatprep.subr.mxu0 %v5239_v3  ;;  %2950 = vmatpush3.msra.mxu1 %v4183_v26  ;;  %v915_v26 = vsub.f32 %v4229_v6, %v4245_v39  ;;  %v4273_v37 = vand.u32 4294901760, %v4261_v11 }
  0x4f   :  { %2915 = vmatpush3.msra.mxu0 %v4116_v59  ;;  %2951 = vmatprep.subr.mxu1 %v5239_v3 }
  0x50   :  { %2916 = vmatprep.subr.mxu0 %v5239_v3  ;;  %2952 = vmatpush3.msra.mxu1 %v4214_v55  ;;  %v4252_v55 = vsub.f32 %v714_v56, %v4233_v10  ;;  %v4270_v56 = vand.u32 4294901760, %v915_v26  ;;  %5283 = vst [vmem:[#allocation27_spill] sm:$0xff] %v4273_v37 }
  0x51   :  { %2917 = vmatpush3.msra.mxu0 %v4138_v5  ;;  %2953 = vmatprep.subr.mxu1 %v5239_v3 }
  0x52   :  { %2918 = vmatprep.subr.mxu0 %v5239_v3  ;;  %2954 = vmatpush3.msra.mxu1 %v4221_v61  ;;  %v4266_v61 = vand.u32 4294901760, %v4252_v55  ;;  %5282 = vst [vmem:[#allocation26_spill] sm:$0xff] %v4270_v56 }
  0x53   :  { %2919 = vmatpush3.msra.mxu0 %v4152_v8  ;;  %2955 = vmatprep.subr.mxu1 %v5239_v3 }
  0x54   :  { %2920 = vmatprep.subr.mxu0 %v5239_v3  ;;  %2956 = vmatpush3.msra.mxu1 %v4240_v22  ;;  %5281 = vst [vmem:[#allocation25_spill] sm:$0xff] %v4266_v61  ;;  %v922_v12 = vsub.f32 %v4252_v55, %v4266_v61  ;;  %v929_v22 = vsub.f32 %v4261_v11, %v4273_v37 }
  0x55   :  { %2921 = vmatpush3.msra.mxu0 %v4171_v17  ;;  %2957 = vmatprep.subr.mxu1 %v5239_v3 }
  0x56   :  { %2922 = vmatprep.subr.mxu0 %v5239_v3  ;;  %2958 = vmatpush3.msra.mxu1 %v4256_v63  ;;  %v4283_v4 = vand.u32 4294901760, %v922_v12  ;;  %v4288_v26 = vand.u32 4294901760, %v929_v22 }
  0x57   :  { %2923 = vmatpush3.msra.mxu0 %v4191_v33  ;;  %2959 = vmatprep.subr.mxu1 %v5239_v3 }
  0x58   :  { %2924 = vmatprep.subr.mxu0 %v5239_v3  ;;  %2960 = vmatpush3.msra.mxu1 %v4270_v56  ;;  %5284 = vst [vmem:[#allocation28_spill] sm:$0xff] %v4283_v4  ;;  %5285 = vst [vmem:[#allocation29_spill] sm:$0xff] %v4288_v26 }
  0x59   :  { %2925 = vmatpush3.msra.mxu0 %v4210_v54  ;;  %2965 = vmatprep.mubr.msk.f32.mxu1 %vm3533_vm3, %v5239_v3 }
  0x5a   :  { %2926 = vmatprep.subr.mxu0 %v5239_v3  ;;  %2961 = vmatprep.subr.mxu1 %v5239_v3 }
  0x5b   :  { %2927 = vmatpush3.msra.mxu0 %v4233_v10  ;;  %2930 = vmatprep.mubr.msk.f32.mxu0 %vm3533_vm3, %v5239_v3 }
  0x5c   :  { %2928 = vmatprep.subr.mxu0 %v5239_v3  ;;  %2962 = vmatpush3.msra.mxu1 %v4283_v4 }
  0x5d   :  { %2929 = vmatpush3.msra.mxu0 %v4247_v43  ;;  %2963 = vmatprep.subr.mxu1 %v5239_v3 }
  0x5e   :  { %2968 = vmatprep.subr.mxu0 %v5239_v3  ;;  %2964 = vmatpush3.msra.mxu1 %v4288_v26 }
  0x5f   :  { %3003 = vmatprep.subr.mxu1 %v5239_v3 }
  0xd2   :  { %v211_v12 = vpop.f32.mrf.mxu0 }
  0xd3   :  { %v292_v56 = vpop.f32.mrf.mxu1 }
  0xd4   :  { %v213_v63 = vpop.f32.mrf.mxu0 }
  0xd5   :  { %v294_v62 = vpop.f32.mrf.mxu1 }
  0xd6   :  { %v295_v60 = vadd.f32 %v294_v62, %v213_v63  ;;  %v293_v63 = vadd.f32 %v292_v56, %v211_v12 }
  0xdf   :  { %v217_v50 = vpop.f32.mrf.mxu0 }
  0xe0   :  { %v298_v37 = vpop.f32.mrf.mxu1 }
  0xe1   :  { %v219_v22 = vpop.f32.mrf.mxu0  ;;  %v299_v3 = vadd.f32 %v298_v37, %v217_v50 }
  0xe2   :  { %v300_v44 = vpop.f32.mrf.mxu1 }
  0xe3   :  { %v301_v61 = vadd.f32 %v300_v44, %v219_v22 }
  0xe6   :  { %v379_v38 = vpop.f32.mrf.mxu0 }
  0xe7   :  { %v390_v44 = vadd.f32 %v379_v38, %v293_v63 }
  0xe8   :  { %v381_v39 = vpop.f32.mrf.mxu0  ;;  %v509_v19 = vpop.f32.mrf.mxu1 }
  0xe9   :  { %v391_v32 = vadd.f32 %v381_v39, %v295_v60  ;;  %v398_v60 = vrot.slane %v3983_v15, %v4300_v27 }
  0xea   :  { %v511_v39 = vpop.f32.mrf.mxu1 }
  0xeb   :  { %v4297_v4 = vadd.f32 %v3986_v16, %v391_v32 }
  0xec   :  { %v385_v1 = vpop.f32.mrf.mxu0 }
  0xed   :  { %5286 = vst [vmem:[#allocation30_spill] sm:$0xff] %v4297_v4  ;;  %v392_v7 = vadd.f32 %v385_v1, %v299_v3  ;;  %v4309_v4 = vadd.f32 %v398_v60, %v390_v44 }
  0xee   :  { %v387_v26 = vpop.f32.mrf.mxu0 }
  0xef   :  { %v393_v45 = vadd.f32 %v387_v26, %v301_v61  ;;  %v4307_v32 = vadd.f32 %v398_v60, %v392_v7  ;;  %5290 = vst [vmem:[#allocation34_spill] sm:$0xff] %v4309_v4 }
  0xf1   :  { %v4303_v62 = vadd.f32 %v3986_v16, %v393_v45  ;;  %5289 = vst [vmem:[#allocation33_spill] sm:$0xff] %v4307_v32  ;;  %v409_v13 = vadd.f32 %v4307_v32, %v4309_v4 }
  0xf3   :  { %5288 = vst [vmem:[#allocation32_spill] sm:$0xff] %v4303_v62  ;;  %v410_v3 = vrot.slane %v409_v13, 4 }
  0xf5   :  { %v515_v22 = vpop.f32.mrf.mxu1  ;;  %v411_v27 = vadd.f32 %v410_v3, %v409_v13 }
  0xf7   :  { %v517_v50 = vpop.f32.mrf.mxu1  ;;  %v412_v51 = vrot.slane %v411_v27, 2 }
  0xf9   :  { %v413_v13 = vadd.f32 %v412_v51, %v411_v27 }
  0xfa   :  { %v590_v61 = vpop.f32.mrf.mxu0 }
  0xfb   :  { %v676_v37 = vpop.f32.mrf.mxu1  ;;  %v591_v45 = vadd.f32 %v590_v61, %v509_v19 }
  0xfc   :  { %v592_v26 = vpop.f32.mrf.mxu0 }
  0xfd   :  { %v678_v56 = vpop.f32.mrf.mxu1  ;;  %v593_v38 = vadd.f32 %v592_v26, %v511_v39  ;;  %v687_v15 = vadd.f32 %v676_v37, %v591_v45 }
  0xfe   :  { %v596_v1 = vpop.f32.mrf.mxu0 }
  0xff   :  { %v682_v12 = vpop.f32.mrf.mxu1  ;;  %v688_v63 = vadd.f32 %v678_v56, %v593_v38  ;;  %v597_v7 = vadd.f32 %v596_v1, %v515_v22  ;;  %v4316_v32 = vadd.f32 %v687_v15, %v398_v60  ;;  %v414_v56 = vrot.slane %v413_v13, 1 }
 0x100   :  { %v598_v62 = vpop.f32.mrf.mxu0 }
 0x101   :  { %v4314_v44 = vadd.f32 %v688_v63, %v3986_v16  ;;  %v689_v0 = vadd.f32 %v682_v12, %v597_v7  ;;  %v599_v57 = vadd.f32 %v598_v62, %v517_v50  ;;  %v684_v4 = vpop.f32.mrf.mxu1  ;;  %v415_v50 = vadd.f32 %v414_v56, %v413_v13  ;;  %v5294_v12 = vld [vmem:[#allocation8_spill] sm:$0xff]  ;;  %v5295_v63 = vld [vmem:[#allocation11_spill] sm:$0xff]  ;;  %v5296_v7 = vld [vmem:[#allocation33_spill] sm:$0xff] }
 0x102   :  { %v5298_v13 = vld [vmem:[#allocation34_spill] sm:$0xff]  ;;  %v5299_v56 = vld [vmem:[#allocation15_spill] sm:$0xff] }
 0x103   :  { %5291 = vst [vmem:[#allocation35_spill] sm:$0xff] %v4314_v44  ;;  %v4318_v19 = vadd.f32 %v689_v0, %v398_v60  ;;  %v690_v61 = vadd.f32 %v684_v4, %v599_v57  ;;  %v5293_v60 = vld [vmem:[#allocation7_spill] sm:$0xff]  ;;  %v5311_v44 = vld [vmem:[#allocation10_spill] sm:$0xff] }
 0x105   :  { %v695_v39 = vadd.f32 %v4318_v19, %v4316_v32  ;;  %v4323_v37 = vadd.f32 %v690_v61, %v3986_v16  ;;  %v5292_v16 = vmov 0.0   ;;  %v704_v15 = vmul.f32 %v4318_v19, %v4318_v19 }
 0x106   :  { %v418_v61 = vmul.f32 %v5296_v7, %v5296_v7 }
 0x107   :  { %v696_v22 = vrot.slane %v695_v39, 4 }
 0x109   :  { %v697_v45 = vadd.f32 %v696_v22, %v695_v39  ;;  %v703_v39 = vmul.f32 %v4316_v32, %v4316_v32  ;;  %v5297_v22 = vld [vmem:[#allocation13_spill] sm:$0xff] }
 0x10b   :  { %v698_v26 = vrot.slane %v697_v45, 2 }
 0x10d   :  { %v699_v3 = vadd.f32 %v698_v26, %v697_v45  ;;  %v417_v45 = vmul.f32 %v5298_v13, %v5298_v13  ;;  %v705_v26 = vadd.f32 %v704_v15, %v703_v39  ;;  %v5304_v15 = vld [vmem:[#allocation23_spill] sm:$0xff] }
 0x10f   :  { %v700_v62 = vrot.slane %v699_v3, 1 }
 0x111   :  { %v701_v38 = vadd.f32 %v700_v62, %v699_v3  ;;  %v419_v3 = vadd.f32 %v418_v61, %v417_v45  ;;  %v5300_v62 = vld [vmem:[#allocation17_spill] sm:$0xff]  ;;  %v5305_v61 = vld [vmem:[#allocation4_spill] sm:$0xff] }
 0x112   :  { %v5306_v45 = vld [vmem:[#allocation25_spill] sm:$0xff] }
 0x113   :  { %v702_v1 = vadd.f32 %v701_v38, %v415_v50  ;;  %v706_v50 = vrot.slane %v705_v26, 4  ;;  %v5301_v38 = vld [vmem:[#allocation18_spill] sm:$0xff] }
 0x115   :  { %v4325_v0 = vand.u32 4294901760, %v702_v1 }
 0x117   :  { %v4328_v57 = vsub.f32 %v702_v1, %v4325_v0  ;;  %2966 = vmatmul.mubr.f32.vlgmr.msra.gmra.mxu1 %v4325_v0  ;;  %v420_v1 = vrot.slane %v419_v3, 4 }
 0x118   :  { %3004 = vmatpush3.msra.mxu1 %v3991_v18  ;;  %3035 = vmatprep.mubr.msk.f32.mxu1 %vm3533_vm3, %v5292_v16 }
 0x119   :  { %3005 = vmatprep.subr.mxu1 %v5292_v16  ;;  %v812_v51 = vand.u32 4294901760, %v4328_v57 }
 0x11a   :  { %3006 = vmatpush3.msra.mxu1 %v3999_v21 }
 0x11b   :  { %3007 = vmatprep.subr.mxu1 %v5292_v16  ;;  %v813_v4 = vsub.f32 %v4328_v57, %v812_v51 }
 0x11c   :  { %3008 = vmatpush3.msra.mxu1 %v4012_v25 }
 0x11d   :  { %3009 = vmatprep.subr.mxu1 %v5292_v16  ;;  %v814_v27 = vand.u32 4294901760, %v813_v4  ;;  %v5303_v4 = vld [vmem:[#allocation3_spill] sm:$0xff] }
 0x11e   :  { %3010 = vmatpush3.msra.mxu1 %v4027_v30 }
 0x11f   :  { %3011 = vmatprep.subr.mxu1 %v5292_v16  ;;  %2931 = vmatmul.mubr.f32.vlgmr.msra.gmra.mxu0 %v814_v27  ;;  %v421_v27 = vadd.f32 %v420_v1, %v419_v3  ;;  %v5308_v3 = vld [vmem:[#allocation27_spill] sm:$0xff]  ;;  %v5309_v1 = vld [vmem:[#allocation6_spill] sm:$0xff] }
 0x120   :  { %2969 = vmatpush3.msra.mxu0 %v3997_v20  ;;  %3012 = vmatpush3.msra.mxu1 %v4045_v36 }
 0x121   :  { %2970 = vmatprep.subr.mxu0 %v5292_v16  ;;  %3013 = vmatprep.subr.mxu1 %v5292_v16 }
 0x122   :  { %2971 = vmatpush3.msra.mxu0 %v4010_v24  ;;  %3014 = vmatpush3.msra.mxu1 %v4059_v41 }
 0x123   :  { %2972 = vmatprep.subr.mxu0 %v5292_v16  ;;  %3015 = vmatprep.subr.mxu1 %v5292_v16 }
 0x124   :  { %2973 = vmatpush3.msra.mxu0 %v4025_v29  ;;  %3016 = vmatpush3.msra.mxu1 %v4077_v47 }
 0x125   :  { %2974 = vmatprep.subr.mxu0 %v5292_v16  ;;  %3017 = vmatprep.subr.mxu1 %v5292_v16 }
 0x126   :  { %2975 = vmatpush3.msra.mxu0 %v4042_v35  ;;  %3018 = vmatpush3.msra.mxu1 %v4097_v53 }
 0x127   :  { %2976 = vmatprep.subr.mxu0 %v5292_v16  ;;  %3019 = vmatprep.subr.mxu1 %v5292_v16 }
 0x128   :  { %2977 = vmatpush3.msra.mxu0 %v4063_v42  ;;  %3020 = vmatpush3.msra.mxu1 %v4116_v59 }
 0x129   :  { %2978 = vmatprep.subr.mxu0 %v5292_v16  ;;  %3021 = vmatprep.subr.mxu1 %v5292_v16 }
 0x12a   :  { %2979 = vmatpush3.msra.mxu0 %v4075_v46  ;;  %3022 = vmatpush3.msra.mxu1 %v4138_v5 }
 0x12b   :  { %2980 = vmatprep.subr.mxu0 %v5292_v16  ;;  %3023 = vmatprep.subr.mxu1 %v5292_v16 }
 0x12c   :  { %2981 = vmatpush3.msra.mxu0 %v4095_v52  ;;  %3024 = vmatpush3.msra.mxu1 %v4152_v8 }
 0x12d   :  { %2982 = vmatprep.subr.mxu0 %v5292_v16  ;;  %3025 = vmatprep.subr.mxu1 %v5292_v16 }
 0x12e   :  { %2983 = vmatpush3.msra.mxu0 %v4114_v58  ;;  %3026 = vmatpush3.msra.mxu1 %v4171_v17 }
 0x12f   :  { %2984 = vmatprep.subr.mxu0 %v5292_v16  ;;  %3027 = vmatprep.subr.mxu1 %v5292_v16 }
 0x130   :  { %2985 = vmatpush3.msra.mxu0 %v4134_v2  ;;  %3028 = vmatpush3.msra.mxu1 %v4191_v33 }
 0x131   :  { %2986 = vmatprep.subr.mxu0 %v5292_v16  ;;  %3029 = vmatprep.subr.mxu1 %v5292_v16 }
 0x132   :  { %2987 = vmatpush3.msra.mxu0 %v4157_v9  ;;  %3030 = vmatpush3.msra.mxu1 %v4210_v54 }
 0x133   :  { %2988 = vmatprep.subr.mxu0 %v5292_v16  ;;  %3031 = vmatprep.subr.mxu1 %v5292_v16 }
 0x134   :  { %2989 = vmatpush3.msra.mxu0 %v4169_v14  ;;  %3032 = vmatpush3.msra.mxu1 %v4233_v10 }
 0x135   :  { %2990 = vmatprep.subr.mxu0 %v5292_v16  ;;  %3033 = vmatprep.subr.mxu1 %v5292_v16 }
 0x136   :  { %2991 = vmatpush3.msra.mxu0 %v4189_v31  ;;  %3034 = vmatpush3.msra.mxu1 %v4247_v43 }
 0x137   :  { %2992 = vmatprep.subr.mxu0 %v5292_v16  ;;  %3036 = vmatmul.mubr.f32.vlgmr.msra.gmra.mxu1 %v812_v51  ;;  %v5302_v51 = vld [vmem:[#allocation21_spill] sm:$0xff] }
 0x138   :  { %3073 = vmatprep.subr.mxu1 %v5292_v16  ;;  %2993 = vmatpush3.msra.mxu0 %v4208_v49 }
 0x139   :  { %3074 = vmatpush3.msra.mxu1 %v3991_v18  ;;  %2994 = vmatprep.subr.mxu0 %v5292_v16 }
 0x13a   :  { %3075 = vmatprep.subr.mxu1 %v5292_v16  ;;  %2995 = vmatpush3.msra.mxu0 %v4229_v6 }
 0x13b   :  { %3076 = vmatpush3.msra.mxu1 %v3999_v21  ;;  %2996 = vmatprep.subr.mxu0 %v5292_v16 }
 0x13c   :  { %3077 = vmatprep.subr.mxu1 %v5292_v16  ;;  %2997 = vmatpush3.msra.mxu0 %v4252_v55 }
 0x13d   :  { %3078 = vmatpush3.msra.mxu1 %v4012_v25  ;;  %2998 = vmatprep.subr.mxu0 %v5292_v16 }
 0x13e   :  { %3079 = vmatprep.subr.mxu1 %v5292_v16  ;;  %2999 = vmatpush3.msra.mxu0 %v4261_v11 }
 0x13f   :  { %3000 = vmatprep.mubr.msk.f32.mxu0 %vm3533_vm3, %v5292_v16  ;;  %3080 = vmatpush3.msra.mxu1 %v4027_v30 }
 0x140   :  { %3001 = vmatmul.mubr.f32.vlgmr.msra.gmra.mxu0 %v4328_v57  ;;  %3038 = vmatprep.subr.mxu0 %v5292_v16  ;;  %v707_v57 = vadd.f32 %v706_v50, %v705_v26  ;;  %v5307_v26 = vld [vmem:[#allocation5_spill] sm:$0xff]  ;;  %v422_v50 = vrot.slane %v421_v27, 2 }
 0x141   :  { %3081 = vmatprep.subr.mxu1 %v5292_v16  ;;  %3039 = vmatpush3.msra.mxu0 %v4007_v23 }
 0x142   :  { %3082 = vmatpush3.msra.mxu1 %v4045_v36  ;;  %3040 = vmatprep.subr.mxu0 %v5292_v16  ;;  %v708_v39 = vrot.slane %v707_v57, 2 }
 0x143   :  { %3083 = vmatprep.subr.mxu1 %v5292_v16  ;;  %3041 = vmatpush3.msra.mxu0 %v4022_v28 }
 0x144   :  { %3084 = vmatpush3.msra.mxu1 %v4059_v41  ;;  %3042 = vmatprep.subr.mxu0 %v5292_v16 }
 0x145   :  { %3085 = vmatprep.subr.mxu1 %v5292_v16  ;;  %3043 = vmatpush3.msra.mxu0 %v4039_v34 }
 0x146   :  { %3086 = vmatpush3.msra.mxu1 %v4077_v47  ;;  %3044 = vmatprep.subr.mxu0 %v5292_v16 }
 0x147   :  { %3087 = vmatprep.subr.mxu1 %v5292_v16  ;;  %3045 = vmatpush3.msra.mxu0 %v4057_v40 }
 0x148   :  { %3088 = vmatpush3.msra.mxu1 %v4097_v53  ;;  %3046 = vmatprep.subr.mxu0 %v5292_v16 }
 0x149   :  { %3089 = vmatprep.subr.mxu1 %v5292_v16  ;;  %3047 = vmatpush3.msra.mxu0 %v4082_v48 }
 0x14a   :  { %3090 = vmatpush3.msra.mxu1 %v4116_v59  ;;  %3048 = vmatprep.subr.mxu0 %v5292_v16 }
 0x14b   :  { %3091 = vmatprep.subr.mxu1 %v5292_v16  ;;  %3049 = vmatpush3.msra.mxu0 %v5293_v60 }
 0x14c   :  { %3092 = vmatpush3.msra.mxu1 %v4138_v5  ;;  %3050 = vmatprep.subr.mxu0 %v5292_v16 }
 0x14d   :  { %3093 = vmatprep.subr.mxu1 %v5292_v16  ;;  %3051 = vmatpush3.msra.mxu0 %v5294_v12 }
 0x14e   :  { %3094 = vmatpush3.msra.mxu1 %v4152_v8  ;;  %3052 = vmatprep.subr.mxu0 %v5292_v16 }
 0x14f   :  { %3095 = vmatprep.subr.mxu1 %v5292_v16  ;;  %3053 = vmatpush3.msra.mxu0 %v5295_v63 }
 0x150   :  { %3096 = vmatpush3.msra.mxu1 %v4171_v17  ;;  %3054 = vmatprep.subr.mxu0 %v5292_v16 }
 0x151   :  { %3097 = vmatprep.subr.mxu1 %v5292_v16  ;;  %3055 = vmatpush3.msra.mxu0 %v5297_v22 }
 0x152   :  { %3098 = vmatpush3.msra.mxu1 %v4191_v33  ;;  %3056 = vmatprep.subr.mxu0 %v5292_v16 }
 0x153   :  { %3099 = vmatprep.subr.mxu1 %v5292_v16  ;;  %3057 = vmatpush3.msra.mxu0 %v5299_v56 }
 0x154   :  { %3100 = vmatpush3.msra.mxu1 %v4210_v54  ;;  %3058 = vmatprep.subr.mxu0 %v5292_v16 }
 0x155   :  { %3101 = vmatprep.subr.mxu1 %v5292_v16  ;;  %3059 = vmatpush3.msra.mxu0 %v5300_v62 }
 0x156   :  { %3102 = vmatpush3.msra.mxu1 %v4233_v10  ;;  %3060 = vmatprep.subr.mxu0 %v5292_v16 }
 0x157   :  { %3103 = vmatprep.subr.mxu1 %v5292_v16  ;;  %3061 = vmatpush3.msra.mxu0 %v5301_v38 }
 0x158   :  { %3104 = vmatpush3.msra.mxu1 %v4247_v43  ;;  %3105 = vmatprep.mubr.msk.f32.mxu1 %vm3533_vm3, %v5292_v16 }
 0x159   :  { %3062 = vmatprep.subr.mxu0 %v5292_v16  ;;  %3106 = vmatmul.mubr.f32.vlgmr.msra.gmra.mxu1 %v4325_v0 }
 0x15a   :  { %3143 = vmatprep.subr.mxu1 %v5292_v16  ;;  %3063 = vmatpush3.msra.mxu0 %v5302_v51 }
 0x15b   :  { %3144 = vmatpush3.msra.mxu1 %v5303_v4  ;;  %3064 = vmatprep.subr.mxu0 %v5292_v16  ;;  %v709_v4 = vadd.f32 %v708_v39, %v707_v57  ;;  %v5312_v57 = vld [vmem:[#allocation12_spill] sm:$0xff]  ;;  %v5313_v39 = vld [vmem:[#allocation14_spill] sm:$0xff] }
 0x15c   :  { %3145 = vmatprep.subr.mxu1 %v5292_v16  ;;  %3065 = vmatpush3.msra.mxu0 %v5304_v15 }
 0x15d   :  { %3146 = vmatpush3.msra.mxu1 %v5305_v61  ;;  %3066 = vmatprep.subr.mxu0 %v5292_v16  ;;  %v423_v61 = vadd.f32 %v422_v50, %v421_v27  ;;  %v5314_v50 = vld [vmem:[#allocation16_spill] sm:$0xff] }
 0x15e   :  { %3147 = vmatprep.subr.mxu1 %v5292_v16  ;;  %3067 = vmatpush3.msra.mxu0 %v5306_v45 }
 0x15f   :  { %3148 = vmatpush3.msra.mxu1 %v5307_v26  ;;  %3068 = vmatprep.subr.mxu0 %v5292_v16  ;;  %v5310_v26 = vld [vmem:[#allocation9_spill] sm:$0xff]  ;;  %v424_v27 = vrot.slane %v423_v61, 1 }
 0x160   :  { %3149 = vmatprep.subr.mxu1 %v5292_v16  ;;  %3069 = vmatpush3.msra.mxu0 %v5308_v3 }
 0x161   :  { %3070 = vmatprep.mubr.msk.f32.mxu0 %vm3533_vm3, %v5292_v16  ;;  %3150 = vmatpush3.msra.mxu1 %v5309_v1  ;;  %v425_v1 = vadd.f32 %v424_v27, %v423_v61  ;;  %v5317_v61 = vld [vmem:[#allocation22_spill] sm:$0xff]  ;;  %v5318_v27 = vld [vmem:[#allocation24_spill] sm:$0xff] }
 0x162   :  { %3071 = vmatmul.mubr.f32.vlgmr.msra.gmra.mxu0 %v4325_v0  ;;  %3108 = vmatprep.subr.mxu0 %v5292_v16  ;;  %v710_v0 = vrot.slane %v709_v4, 1 }
 0x163   :  { %3151 = vmatprep.subr.mxu1 %v5292_v16  ;;  %3109 = vmatpush3.msra.mxu0 %v3991_v18 }
 0x164   :  { %3152 = vmatpush3.msra.mxu1 %v5310_v26  ;;  %3110 = vmatprep.subr.mxu0 %v5292_v16  ;;  %v5315_v26 = vld [vmem:[#allocation19_spill] sm:$0xff] }
 0x165   :  { %3153 = vmatprep.subr.mxu1 %v5292_v16  ;;  %3111 = vmatpush3.msra.mxu0 %v3999_v21 }
 0x166   :  { %3154 = vmatpush3.msra.mxu1 %v5311_v44  ;;  %3112 = vmatprep.subr.mxu0 %v5292_v16  ;;  %v711_v44 = vadd.f32 %v710_v0, %v709_v4  ;;  %v5316_v4 = vld [vmem:[#allocation20_spill] sm:$0xff] }
 0x167   :  { %3155 = vmatprep.subr.mxu1 %v5292_v16  ;;  %3113 = vmatpush3.msra.mxu0 %v4012_v25 }
 0x168   :  { %3156 = vmatpush3.msra.mxu1 %v5312_v57  ;;  %3114 = vmatprep.subr.mxu0 %v5292_v16  ;;  %v712_v57 = vadd.f32 %v711_v44, %v425_v1  ;;  %v5321_v1 = vld [vmem:[#allocation29_spill] sm:$0xff] }
 0x169   :  { %3157 = vmatprep.subr.mxu1 %v5292_v16  ;;  %3115 = vmatpush3.msra.mxu0 %v4027_v30 }
 0x16a   :  { %3158 = vmatpush3.msra.mxu1 %v5313_v39  ;;  %3116 = vmatprep.subr.mxu0 %v5292_v16  ;;  %v4519_v0 = vand.u32 4294901760, %v712_v57  ;;  %v5319_v39 = vld [vmem:[#allocation26_spill] sm:$0xff] }
 0x16b   :  { %3159 = vmatprep.subr.mxu1 %v5292_v16  ;;  %3117 = vmatpush3.msra.mxu0 %v4045_v36 }
 0x16c   :  { %3160 = vmatpush3.msra.mxu1 %v5314_v50  ;;  %3118 = vmatprep.subr.mxu0 %v5292_v16  ;;  %v4530_v44 = vsub.f32 %v712_v57, %v4519_v0  ;;  %v5320_v50 = vld [vmem:[#allocation28_spill] sm:$0xff] }
 0x16d   :  { %3161 = vmatprep.subr.mxu1 %v5292_v16  ;;  %3119 = vmatpush3.msra.mxu0 %v4059_v41 }
 0x16e   :  { %3162 = vmatpush3.msra.mxu1 %v5315_v26  ;;  %3120 = vmatprep.subr.mxu0 %v5292_v16  ;;  %v1453_v26 = vand.u32 4294901760, %v4530_v44 }
 0x16f   :  { %3163 = vmatprep.subr.mxu1 %v5292_v16  ;;  %3121 = vmatpush3.msra.mxu0 %v4077_v47 }
 0x170   :  { %3164 = vmatpush3.msra.mxu1 %v5316_v4  ;;  %3122 = vmatprep.subr.mxu0 %v5292_v16  ;;  %v1454_v57 = vsub.f32 %v4530_v44, %v1453_v26 }
 0x171   :  { %3165 = vmatprep.subr.mxu1 %v5292_v16  ;;  %3123 = vmatpush3.msra.mxu0 %v4097_v53 }
 0x172   :  { %3166 = vmatpush3.msra.mxu1 %v5317_v61  ;;  %3124 = vmatprep.subr.mxu0 %v5292_v16  ;;  %v1455_v4 = vand.u32 4294901760, %v1454_v57  ;;  %v4925_v61 = vld [vmem:[%s5208_s5 + $0x80] sm:$0xff] }
 0x173   :  { %3167 = vmatprep.subr.mxu1 %v5292_v16  ;;  %3125 = vmatpush3.msra.mxu0 %v4116_v59 }
 0x174   :  { %3168 = vmatpush3.msra.mxu1 %v5318_v27  ;;  %3126 = vmatprep.subr.mxu0 %v5292_v16 }
 0x175   :  { %3169 = vmatprep.subr.mxu1 %v5292_v16  ;;  %3127 = vmatpush3.msra.mxu0 %v4138_v5 }
 0x176   :  { %3170 = vmatpush3.msra.mxu1 %v5319_v39  ;;  %3128 = vmatprep.subr.mxu0 %v5292_v16 }
 0x177   :  { %3171 = vmatprep.subr.mxu1 %v5292_v16  ;;  %3129 = vmatpush3.msra.mxu0 %v4152_v8 }
 0x178   :  { %3172 = vmatpush3.msra.mxu1 %v5320_v50  ;;  %3130 = vmatprep.subr.mxu0 %v5292_v16 }
 0x179   :  { %3173 = vmatprep.subr.mxu1 %v5292_v16  ;;  %3131 = vmatpush3.msra.mxu0 %v4171_v17 }
 0x17a   :  { %3174 = vmatpush3.msra.mxu1 %v5321_v1  ;;  %3175 = vmatprep.mubr.msk.f32.mxu1 %vm3533_vm3, %v5292_v16 }
 0x17b   :  { %3132 = vmatprep.subr.mxu0 %v5292_v16  ;;  %3176 = vmatmul.mubr.f32.vlgmr.msra.gmra.mxu1 %v4519_v0 }
 0x17c   :  { %3213 = vmatprep.subr.mxu1 %v5292_v16  ;;  %3133 = vmatpush3.msra.mxu0 %v4191_v33 }
 0x17d   :  { %3214 = vmatpush3.msra.mxu1 %v3991_v18  ;;  %3134 = vmatprep.subr.mxu0 %v5292_v16 }
 0x17e   :  { %3215 = vmatprep.subr.mxu1 %v5292_v16  ;;  %3135 = vmatpush3.msra.mxu0 %v4210_v54 }
 0x17f   :  { %3216 = vmatpush3.msra.mxu1 %v3999_v21  ;;  %3136 = vmatprep.subr.mxu0 %v5292_v16 }
 0x180   :  { %3217 = vmatprep.subr.mxu1 %v5292_v16  ;;  %3137 = vmatpush3.msra.mxu0 %v4233_v10 }
 0x181   :  { %3218 = vmatpush3.msra.mxu1 %v4012_v25  ;;  %3138 = vmatprep.subr.mxu0 %v5292_v16 }
 0x182   :  { %3219 = vmatprep.subr.mxu1 %v5292_v16  ;;  %3139 = vmatpush3.msra.mxu0 %v4247_v43 }
 0x183   :  { %3140 = vmatprep.mubr.msk.f32.mxu0 %vm3533_vm3, %v5292_v16  ;;  %3220 = vmatpush3.msra.mxu1 %v4027_v30 }
 0x184   :  { %3141 = vmatmul.mubr.f32.vlgmr.msra.gmra.mxu0 %v1455_v4  ;;  %3178 = vmatprep.subr.mxu0 %v5292_v16 }
 0x185   :  { %3221 = vmatprep.subr.mxu1 %v5292_v16  ;;  %3179 = vmatpush3.msra.mxu0 %v3997_v20 }
 0x186   :  { %3222 = vmatpush3.msra.mxu1 %v4045_v36  ;;  %3180 = vmatprep.subr.mxu0 %v5292_v16 }
 0x187   :  { %3223 = vmatprep.subr.mxu1 %v5292_v16  ;;  %3181 = vmatpush3.msra.mxu0 %v4010_v24 }
 0x188   :  { %3224 = vmatpush3.msra.mxu1 %v4059_v41  ;;  %3182 = vmatprep.subr.mxu0 %v5292_v16 }
 0x189   :  { %3225 = vmatprep.subr.mxu1 %v5292_v16  ;;  %3183 = vmatpush3.msra.mxu0 %v4025_v29 }
 0x18a   :  { %3226 = vmatpush3.msra.mxu1 %v4077_v47  ;;  %3184 = vmatprep.subr.mxu0 %v5292_v16 }
 0x18b   :  { %3227 = vmatprep.subr.mxu1 %v5292_v16  ;;  %3185 = vmatpush3.msra.mxu0 %v4042_v35 }
 0x18c   :  { %3228 = vmatpush3.msra.mxu1 %v4097_v53  ;;  %3186 = vmatprep.subr.mxu0 %v5292_v16 }
 0x18d   :  { %3229 = vmatprep.subr.mxu1 %v5292_v16  ;;  %3187 = vmatpush3.msra.mxu0 %v4063_v42  ;;  %v4720_v42 = vld [vmem:[%s5208_s5 + $0x68] sm:$0xff] }
 0x18e   :  { %3230 = vmatpush3.msra.mxu1 %v4116_v59  ;;  %3188 = vmatprep.subr.mxu0 %v5292_v16 }
 0x18f   :  { %3231 = vmatprep.subr.mxu1 %v5292_v16  ;;  %3189 = vmatpush3.msra.mxu0 %v4075_v46  ;;  %v4727_v46 = vld [vmem:[%s5208_s5 + $0xf0] sm:$0xff] }
 0x190   :  { %3232 = vmatpush3.msra.mxu1 %v4138_v5  ;;  %3190 = vmatprep.subr.mxu0 %v5292_v16 }
 0x191   :  { %3233 = vmatprep.subr.mxu1 %v5292_v16  ;;  %3191 = vmatpush3.msra.mxu0 %v4095_v52 }
 0x192   :  { %3234 = vmatpush3.msra.mxu1 %v4152_v8  ;;  %3192 = vmatprep.subr.mxu0 %v5292_v16 }
 0x193   :  { %3235 = vmatprep.subr.mxu1 %v5292_v16  ;;  %3193 = vmatpush3.msra.mxu0 %v4114_v58  ;;  %v4755_v58 = vld [vmem:[%s5208_s5 + $0xe0] sm:$0xff] }
 0x194   :  { %3236 = vmatpush3.msra.mxu1 %v4171_v17  ;;  %3194 = vmatprep.subr.mxu0 %v5292_v16 }
 0x195   :  { %3237 = vmatprep.subr.mxu1 %v5292_v16  ;;  %3195 = vmatpush3.msra.mxu0 %v4134_v2  ;;  %v4762_v2 = vld [vmem:[%s5208_s5 + $0x50] sm:$0xff] }
 0x196   :  { %3238 = vmatpush3.msra.mxu1 %v4191_v33  ;;  %3196 = vmatprep.subr.mxu0 %v5292_v16 }
 0x197   :  { %3239 = vmatprep.subr.mxu1 %v5292_v16  ;;  %3197 = vmatpush3.msra.mxu0 %v4157_v9  ;;  %v4783_v9 = vld [vmem:[%s5208_s5 + $0xd0] sm:$0xff] }
 0x198   :  { %3240 = vmatpush3.msra.mxu1 %v4210_v54  ;;  %3198 = vmatprep.subr.mxu0 %v5292_v16 }
 0x199   :  { %3241 = vmatprep.subr.mxu1 %v5292_v16  ;;  %3199 = vmatpush3.msra.mxu0 %v4169_v14  ;;  %v4797_v14 = vld [vmem:[%s5208_s5 + $0xc8] sm:$0xff] }
 0x19a   :  { %3242 = vmatpush3.msra.mxu1 %v4233_v10  ;;  %3200 = vmatprep.subr.mxu0 %v5292_v16 }
 0x19b   :  { %3243 = vmatprep.subr.mxu1 %v5292_v16  ;;  %3201 = vmatpush3.msra.mxu0 %v4189_v31 }
 0x19c   :  { %3244 = vmatpush3.msra.mxu1 %v4247_v43  ;;  %3245 = vmatprep.mubr.msk.f32.mxu1 %vm3533_vm3, %v5292_v16 }
 0x19d   :  { %3202 = vmatprep.subr.mxu0 %v5292_v16  ;;  %3246 = vmatmul.mubr.f32.vlgmr.msra.gmra.mxu1 %v1453_v26 }
 0x19e   :  { %3283 = vmatprep.subr.mxu1 %v5292_v16  ;;  %3203 = vmatpush3.msra.mxu0 %v4208_v49 }
 0x19f   :  { %3284 = vmatpush3.msra.mxu1 %v3991_v18  ;;  %3204 = vmatprep.subr.mxu0 %v5292_v16 }
 0x1a0   :  { %3285 = vmatprep.subr.mxu1 %v5292_v16  ;;  %3205 = vmatpush3.msra.mxu0 %v4229_v6  ;;  %v4825_v6 = vld [vmem:[%s5208_s5 + $0xb8] sm:$0xff] }
 0x1a1   :  { %3286 = vmatpush3.msra.mxu1 %v3999_v21  ;;  %3206 = vmatprep.subr.mxu0 %v5292_v16 }
 0x1a2   :  { %3287 = vmatprep.subr.mxu1 %v5292_v16  ;;  %3207 = vmatpush3.msra.mxu0 %v4252_v55 }
 0x1a3   :  { %3288 = vmatpush3.msra.mxu1 %v4012_v25  ;;  %3208 = vmatprep.subr.mxu0 %v5292_v16 }
 0x1a4   :  { %3289 = vmatprep.subr.mxu1 %v5292_v16  ;;  %3209 = vmatpush3.msra.mxu0 %v4261_v11  ;;  %v4790_v11 = vld [vmem:[%s5208_s5 + $0x40] sm:$0xff] }
 0x1a5   :  { %3210 = vmatprep.mubr.msk.f32.mxu0 %vm3533_vm3, %v5292_v16  ;;  %3290 = vmatpush3.msra.mxu1 %v4027_v30 }
 0x1a6   :  { %3211 = vmatmul.mubr.f32.vlgmr.msra.gmra.mxu0 %v4530_v44  ;;  %3248 = vmatprep.subr.mxu0 %v5292_v16 }
 0x1a7   :  { %3291 = vmatprep.subr.mxu1 %v5292_v16  ;;  %3249 = vmatpush3.msra.mxu0 %v4007_v23 }
 0x1a8   :  { %3292 = vmatpush3.msra.mxu1 %v4045_v36  ;;  %3250 = vmatprep.subr.mxu0 %v5292_v16  ;;  %v4700_v36 = vld [vmem:[%s5208_s5 + $0x78] sm:$0xff] }
 0x1a9   :  { %3293 = vmatprep.subr.mxu1 %v5292_v16  ;;  %3251 = vmatpush3.msra.mxu0 %v4022_v28 }
 0x1aa   :  { %3294 = vmatpush3.msra.mxu1 %v4059_v41  ;;  %3252 = vmatprep.subr.mxu0 %v5292_v16  ;;  %v4713_v41 = vld [vmem:[%s5208_s5 + $0xf8] sm:$0xff] }
 0x1ab   :  { %3295 = vmatprep.subr.mxu1 %v5292_v16  ;;  %3253 = vmatpush3.msra.mxu0 %v4039_v34 }
 0x1ac   :  { %3296 = vmatpush3.msra.mxu1 %v4077_v47  ;;  %3254 = vmatprep.subr.mxu0 %v5292_v16  ;;  %v4734_v47 = vld [vmem:[%s5208_s5 + $0x60] sm:$0xff] }
 0x1ad   :  { %3297 = vmatprep.subr.mxu1 %v5292_v16  ;;  %3255 = vmatpush3.msra.mxu0 %v4057_v40  ;;  %v4707_v40 = vld [vmem:[%s5208_s5 + $0x70] sm:$0xff] }
 0x1ae   :  { %3298 = vmatpush3.msra.mxu1 %v4097_v53  ;;  %3256 = vmatprep.subr.mxu0 %v5292_v16  ;;  %v4748_v53 = vld [vmem:[%s5208_s5 + $0x58] sm:$0xff] }
 0x1af   :  { %3299 = vmatprep.subr.mxu1 %v5292_v16  ;;  %3257 = vmatpush3.msra.mxu0 %v4082_v48  ;;  %v4741_v48 = vld [vmem:[%s5208_s5 + $0xe8] sm:$0xff] }
 0x1b0   :  { %3300 = vmatpush3.msra.mxu1 %v4116_v59  ;;  %3258 = vmatprep.subr.mxu0 %v5292_v16 }
 0x1b1   :  { %3301 = vmatprep.subr.mxu1 %v5292_v16  ;;  %3259 = vmatpush3.msra.mxu0 %v5293_v60  ;;  %v4848_v60 = vld [vmem:[%s5208_s5 + $0x20] sm:$0xff] }
 0x1b2   :  { %3302 = vmatpush3.msra.mxu1 %v4138_v5  ;;  %3260 = vmatprep.subr.mxu0 %v5292_v16  ;;  %v4769_v5 = vld [vmem:[%s5208_s5 + $0xd8] sm:$0xff] }
 0x1b3   :  { %3303 = vmatprep.subr.mxu1 %v5292_v16  ;;  %3261 = vmatpush3.msra.mxu0 %v5294_v12  ;;  %v4855_v12 = vld [vmem:[%s5208_s5 + $0xa8] sm:$0xff] }
 0x1b4   :  { %3304 = vmatpush3.msra.mxu1 %v4152_v8  ;;  %3262 = vmatprep.subr.mxu0 %v5292_v16  ;;  %v4776_v8 = vld [vmem:[%s5208_s5 + $0x48] sm:$0xff] }
 0x1b5   :  { %3305 = vmatprep.subr.mxu1 %v5292_v16  ;;  %3263 = vmatpush3.msra.mxu0 %v5295_v63  ;;  %v4862_v63 = vld [vmem:[%s5208_s5 + $0x18] sm:$0xff] }
 0x1b6   :  { %3306 = vmatpush3.msra.mxu1 %v4171_v17  ;;  %3264 = vmatprep.subr.mxu0 %v5292_v16  ;;  %v4804_v17 = vld [vmem:[%s5208_s5 + $0x38] sm:$0xff] }
 0x1b7   :  { %3307 = vmatprep.subr.mxu1 %v5292_v16  ;;  %3265 = vmatpush3.msra.mxu0 %v5297_v22  ;;  %v4869_v22 = vld [vmem:[%s5208_s5 + $0xa0] sm:$0xff] }
 0x1b8   :  { %3308 = vmatpush3.msra.mxu1 %v4191_v33  ;;  %3266 = vmatprep.subr.mxu0 %v5292_v16  ;;  %v4811_v33 = vld [vmem:[%s5208_s5 + $0xc0] sm:$0xff] }
 0x1b9   :  { %3309 = vmatprep.subr.mxu1 %v5292_v16  ;;  %3267 = vmatpush3.msra.mxu0 %v5299_v56  ;;  %v4874_v56 = vld [vmem:[%s5208_s5 + $0x10] sm:$0xff] }
 0x1ba   :  { %3310 = vmatpush3.msra.mxu1 %v4210_v54  ;;  %3268 = vmatprep.subr.mxu0 %v5292_v16  ;;  %v4818_v54 = vld [vmem:[%s5208_s5 + $0x30] sm:$0xff] }
 0x1bb   :  { %3311 = vmatprep.subr.mxu1 %v5292_v16  ;;  %3269 = vmatpush3.msra.mxu0 %v5300_v62  ;;  %v4879_v62 = vld [vmem:[%s5208_s5 + $0x98] sm:$0xff] }
 0x1bc   :  { %3312 = vmatpush3.msra.mxu1 %v4233_v10  ;;  %3270 = vmatprep.subr.mxu0 %v5292_v16 }
 0x1bd   :  { %3313 = vmatprep.subr.mxu1 %v5292_v16  ;;  %3271 = vmatpush3.msra.mxu0 %v5301_v38  ;;  %v4886_v38 = vld [vmem:[%s5208_s5 + $0x8] sm:$0xff] }
 0x1be   :  { %3314 = vmatpush3.msra.mxu1 %v4247_v43  ;;  %3315 = vmatprep.mubr.msk.f32.mxu1 %vm3533_vm3, %v5292_v16  ;;  %v4834_v43 = vld [vmem:[%s5208_s5 + $0x28] sm:$0xff] }
 0x1bf   :  { %3272 = vmatprep.subr.mxu0 %v5292_v16  ;;  %3316 = vmatmul.mubr.f32.vlgmr.msra.gmra.mxu1 %v4519_v0 }
 0x1c0   :  { %3273 = vmatpush3.msra.mxu0 %v5302_v51  ;;  %3280 = vmatprep.mubr.msk.f32.mxu0 %vm3533_vm3, %v5292_v16  ;;  %v4893_v51 = vld [vmem:[%s5208_s5 + $0x90] sm:$0xff] }
 0x1c1   :  { %3274 = vmatprep.subr.mxu0 %v5292_v16  ;;  %3353 = vmatprep.subr.mxu1 %v4713_v41 }
 0x1c2   :  { %3275 = vmatpush3.msra.mxu0 %v5304_v15  ;;  %3354 = vmatpush3.msra.mxu1 %v4713_v41  ;;  %v4900_v15 = vld [vmem:[%s5208_s5] sm:$0xff] }
 0x1c3   :  { %3276 = vmatprep.subr.mxu0 %v5292_v16  ;;  %3355 = vmatprep.subr.mxu1 %v4727_v46 }
 0x1c4   :  { %3277 = vmatpush3.msra.mxu0 %v5306_v45  ;;  %3356 = vmatpush3.msra.mxu1 %v4727_v46  ;;  %v4907_v45 = vld [vmem:[%s5208_s5 + $0x88] sm:$0xff] }
 0x1c5   :  { %3278 = vmatprep.subr.mxu0 %v5292_v16  ;;  %3357 = vmatprep.subr.mxu1 %v4741_v48  ;;  %v4841_v16 = vld [vmem:[%s5208_s5 + $0xb0] sm:$0xff] }
 0x1c6   :  { %3279 = vmatpush3.msra.mxu0 %v5308_v3  ;;  %3358 = vmatpush3.msra.mxu1 %v4741_v48  ;;  %v4918_v3 = vld [vmem:[%s5208_s5 + $0x178] sm:$0xff] }
 0x1c7   :  { %3281 = vmatmul.mubr.f32.vlgmr.msra.gmra.mxu0 %v4519_v0  ;;  %3318 = vmatprep.subr.mxu0 %v4700_v36 }
 0x1c8   :  { %3319 = vmatpush3.msra.mxu0 %v4700_v36  ;;  %3359 = vmatprep.subr.mxu1 %v4755_v58 }
 0x1c9   :  { %3320 = vmatprep.subr.mxu0 %v4707_v40  ;;  %3360 = vmatpush3.msra.mxu1 %v4755_v58 }
 0x1ca   :  { %3321 = vmatpush3.msra.mxu0 %v4707_v40  ;;  %3361 = vmatprep.subr.mxu1 %v4769_v5 }
 0x1cb   :  { %3322 = vmatprep.subr.mxu0 %v4720_v42  ;;  %3362 = vmatpush3.msra.mxu1 %v4769_v5 }
 0x1cc   :  { %3323 = vmatpush3.msra.mxu0 %v4720_v42  ;;  %3363 = vmatprep.subr.mxu1 %v4783_v9 }
 0x1cd   :  { %3324 = vmatprep.subr.mxu0 %v4734_v47  ;;  %3364 = vmatpush3.msra.mxu1 %v4783_v9 }
 0x1ce   :  { %3325 = vmatpush3.msra.mxu0 %v4734_v47  ;;  %3365 = vmatprep.subr.mxu1 %v4797_v14 }
 0x1cf   :  { %3326 = vmatprep.subr.mxu0 %v4748_v53  ;;  %3366 = vmatpush3.msra.mxu1 %v4797_v14 }
 0x1d0   :  { %3327 = vmatpush3.msra.mxu0 %v4748_v53  ;;  %3367 = vmatprep.subr.mxu1 %v4811_v33 }
 0x1d1   :  { %3328 = vmatprep.subr.mxu0 %v4762_v2  ;;  %3368 = vmatpush3.msra.mxu1 %v4811_v33 }
 0x1d2   :  { %3329 = vmatpush3.msra.mxu0 %v4762_v2  ;;  %3369 = vmatprep.subr.mxu1 %v4825_v6 }
 0x1d3   :  { %3330 = vmatprep.subr.mxu0 %v4776_v8  ;;  %3370 = vmatpush3.msra.mxu1 %v4825_v6 }
 0x1d4   :  { %3331 = vmatpush3.msra.mxu0 %v4776_v8  ;;  %3371 = vmatprep.subr.mxu1 %v4841_v16 }
 0x1d5   :  { %3332 = vmatprep.subr.mxu0 %v4790_v11  ;;  %3372 = vmatpush3.msra.mxu1 %v4841_v16 }
 0x1d6   :  { %3333 = vmatpush3.msra.mxu0 %v4790_v11  ;;  %3373 = vmatprep.subr.mxu1 %v4855_v12 }
 0x1d7   :  { %v967_v18 = vpop.f32.mrf.mxu1  ;;  %3334 = vmatprep.subr.mxu0 %v4804_v17  ;;  %3374 = vmatpush3.msra.mxu1 %v4855_v12 }
 0x1d8   :  { %3335 = vmatpush3.msra.mxu0 %v4804_v17  ;;  %3375 = vmatprep.subr.mxu1 %v4869_v22 }
 0x1d9   :  { %v2967_v20 = vpop.f32.mrf.mxu1  ;;  %3336 = vmatprep.subr.mxu0 %v4818_v54  ;;  %3376 = vmatpush3.msra.mxu1 %v4869_v22 }
 0x1da   :  { %3337 = vmatpush3.msra.mxu0 %v4818_v54  ;;  %3377 = vmatprep.subr.mxu1 %v4879_v62 }
 0x1db   :  { %3338 = vmatprep.subr.mxu0 %v4834_v43  ;;  %3378 = vmatpush3.msra.mxu1 %v4879_v62 }
 0x1dc   :  { %3339 = vmatpush3.msra.mxu0 %v4834_v43  ;;  %3379 = vmatprep.subr.mxu1 %v4893_v51 }
 0x1dd   :  { %3340 = vmatprep.subr.mxu0 %v4848_v60  ;;  %3380 = vmatpush3.msra.mxu1 %v4893_v51 }
 0x1de   :  { %3341 = vmatpush3.msra.mxu0 %v4848_v60  ;;  %3381 = vmatprep.subr.mxu1 %v4907_v45 }
 0x1df   :  { %v816_v21 = vpop.f32.mrf.mxu0  ;;  %3342 = vmatprep.subr.mxu0 %v4862_v63  ;;  %3382 = vmatpush3.msra.mxu1 %v4907_v45 }
 0x1e0   :  { %v968_v23 = vadd.f32 %v967_v18, %v816_v21  ;;  %3343 = vmatpush3.msra.mxu0 %v4862_v63  ;;  %3383 = vmatprep.subr.mxu1 %v4925_v61 }
 0x1e1   :  { %v2932_v24 = vpop.f32.mrf.mxu0  ;;  %3344 = vmatprep.subr.mxu0 %v4874_v56  ;;  %3384 = vmatpush3.msra.mxu1 %v4925_v61 }
 0x1e2   :  { %3345 = vmatpush3.msra.mxu0 %v4874_v56  ;;  %3423 = vmatprep.subr.mxu1 %v4700_v36 }
 0x1e3   :  { %3346 = vmatprep.subr.mxu0 %v4886_v38 }
 0x1e4   :  { %3347 = vmatpush3.msra.mxu0 %v4886_v38 }
 0x1e5   :  { %3348 = vmatprep.subr.mxu0 %v4900_v15 }
 0x1e6   :  { %3349 = vmatpush3.msra.mxu0 %v4900_v15 }
 0x1e7   :  { %3388 = vmatprep.subr.mxu0 %v4918_v3 }
 0x1f7   :  { %v1160_v25 = vpop.f32.mrf.mxu1 }
 0x1f9   :  { %v3037_v28 = vpop.f32.mrf.mxu1 }
 0x200   :  { %v1071_v29 = vpop.f32.mrf.mxu0 }
 0x201   :  { %v1072_v30 = vadd.f32 %v1071_v29, %v968_v23 }
 0x202   :  { %v3002_v34 = vpop.f32.mrf.mxu0 }
 0x203   :  { %v1161_v35 = vadd.f32 %v1160_v25, %v1072_v30 }
 0x219   :  { %v1366_v52 = vpop.f32.mrf.mxu1 }
 0x21b   :  { %v3107_v59 = vpop.f32.mrf.mxu1 }
 0x222   :  { %v1279_v31 = vpop.f32.mrf.mxu0 }
 0x223   :  { %v1280_v49 = vadd.f32 %v1279_v31, %v1161_v35 }
 0x224   :  { %v3072_v55 = vpop.f32.mrf.mxu0 }
 0x225   :  { %v4827_v10 = vadd.f32 %v1366_v52, %v1280_v49  ;;  %v2015_v52 = vld [vmem:[%s5209_s3] sm:$0x1] }
 0x226   :  { %v2017_v49 = vld [vmem:[%s5210_s4] sm:$0x1] }
 0x227   :  { %v2011_v29 = vmul.f32 %v4827_v10, %v4827_v10 }
 0x23b   :  { %v1608_v0 = vpop.f32.mrf.mxu1 }
 0x23d   :  { %v3177_v27 = vpop.f32.mrf.mxu1 }
 0x244   :  { %v1457_v39 = vpop.f32.mrf.mxu0 }
 0x245   :  { %v1609_v18 = vadd.f32 %v1608_v0, %v1457_v39  ;;  %v5322_v0 = vld [vmem:[#allocation31_spill] sm:$0xff] }
 0x246   :  { %v3142_v44 = vpop.f32.mrf.mxu0 }
 0x25d   :  { %v1801_v50 = vpop.f32.mrf.mxu1 }
 0x25f   :  { %v3247_v1 = vpop.f32.mrf.mxu1 }
 0x266   :  { %v1712_v26 = vpop.f32.mrf.mxu0 }
 0x267   :  { %v1713_v21 = vadd.f32 %v1712_v26, %v1609_v18 }
 0x268   :  { %v3212_v57 = vpop.f32.mrf.mxu0 }
 0x269   :  { %v1802_v23 = vadd.f32 %v1801_v50, %v1713_v21 }
 0x27f   :  { %v2007_v4 = vpop.f32.mrf.mxu1 }
 0x281   :  { %v3317_v20 = vpop.f32.mrf.mxu1 }
 0x287   :  { %v1920_v24 = vpop.f32.mrf.mxu0 }
 0x288   :  { %v1921_v25 = vadd.f32 %v1920_v24, %v1802_v23 }
 0x289   :  { %v3282_v28 = vpop.f32.mrf.mxu0 }
 0x28a   :  { %v2008_v30 = vadd.f32 %v2007_v4, %v1921_v25 }
 0x28c   :  { %v2012_v34 = vsub.f32 %v2008_v30, %v2011_v29 }
 0x28e   :  { %v2013_v35 = vadd.f32 1e-05, %v2012_v34 }
 0x290   :  { %3530 = vrsqrt.f32 %v2013_v35 }
 0x29d   :  { %v3531_v59 = vpop.eup %3530 }
 0x29e   :  { %v2016_v31 = vmul.f32 %v3531_v59, %v2015_v52 }
 0x2a0   :  { %v2018_v55 = vmul.f32 %v2016_v31, %v4827_v10  ;;  %v2024_v27 = vrot.slane %v2016_v31, %v5322_v0  ;;  %v4966_v31 = vld [vmem:[%s5208_s5 + $0x168] sm:$0xff] }
 0x2a2   :  { %v2019_v39 = vsub.f32 %v2017_v49, %v2018_v55  ;;  %v2025_v44 = vmul.f32 %v2024_v27, %v5298_v13  ;;  %v2026_v50 = vmul.f32 %v2024_v27, %v5296_v7  ;;  %v2300_v26 = vmul.f32 %v2024_v27, %v4316_v32  ;;  %v4952_v32 = vld [vmem:[%s5208_s5 + $0x170] sm:$0xff]  ;;  %v4974_v55 = vld [vmem:[%s5208_s5 + $0x160] sm:$0xff] }
 0x2a3   :  { %v2301_v57 = vmul.f32 %v2024_v27, %v4318_v19 }
 0x2a4   :  { %v2031_v1 = vrot.slane %v2019_v39, %v5322_v0  ;;  %v4982_v0 = vld [vmem:[%s5208_s5 + $0x158] sm:$0xff] }
 0x2a6   :  { %v2033_v4 = vadd.f32 %v2031_v1, %v2025_v44  ;;  %v2034_v18 = vadd.f32 %v2031_v1, %v2026_v50  ;;  %v2302_v20 = vadd.f32 %v2300_v26, %v2031_v1  ;;  %v2303_v21 = vadd.f32 %v2301_v57, %v2031_v1 }
 0x2a8   :  { %v2035_v23 = vmax.f32 %v2033_v4, 0.0  ;;  %v2036_v24 = vmax.f32 %v2034_v18, 0.0  ;;  %v2304_v10 = vmax.f32 %v2302_v20, 0.0  ;;  %v2305_v25 = vmax.f32 %v2303_v21, 0.0 }
 0x2aa   :  { %2037 = vst [vmem:[#allocation2 + $0x1] sm:$0xff] %v2035_v23  ;;  %2038 = vst [vmem:[#allocation2 + $0x9] sm:$0xff] %v2036_v24 }
 0x2b1   :  { %v2039_v28 = vld [vmem:[#allocation2] sm:$0xff]  ;;  %v4945_v13 = vld [vmem:[#allocation2 + $0x8] sm:$0xff]  ;;  %v4947_v7 = vld [vmem:[#allocation2 + $0x10] sm:$0x3] }
 0x2b2   :  { %3350 = vmatprep.mubr.f32.mxu0 %v2039_v28  ;;  %2306 = vst [vmem:[#allocation2 + $0x1] sm:$0xff] %v2304_v10  ;;  %v2130_v19 = vrot.slane %v2039_v28, 1  ;;  %v2131_v29 = vrot.slane %v4945_v13, 1  ;;  %v2214_v30 = vrot.slane %v2039_v28, 2  ;;  %v2215_v34 = vrot.slane %v4945_v13, 2  ;;  %2307 = vst [vmem:[#allocation2 + $0x9] sm:$0xff] %v2305_v25 }
 0x2b3   :  { %3351 = vmatmul.mubr.f32.vlgmr.msra.gmra.mxu0 %v4945_v13  ;;  %v2133_v35 = vrot.slane %v4947_v7, 1  ;;  %v2217_v44 = vrot.slane %v4947_v7, 2  ;;  %v5325_v25 = vld [vmem:[#allocation35_spill] sm:$0xff] }
 0x2b4   :  { %3389 = vmatpush3.msra.mxu0 %v4918_v3  ;;  %v2132_v52 = vsel %vm134_vm0, %v2130_v19, %v2131_v29  ;;  %v2216_v59 = vsel %vm303_vm2, %v2214_v30, %v2215_v34 }
 0x2b5   :  { %3390 = vmatprep.subr.mxu0 %v4952_v32  ;;  %3385 = vmatprep.mubr.f32.mxu1 %v2132_v52  ;;  %v2134_v49 = vsel %vm134_vm0, %v2131_v29, %v2133_v35 }
 0x2b6   :  { %3391 = vmatpush3.msra.mxu0 %v4952_v32  ;;  %3420 = vmatprep.mubr.f32.mxu0 %v2216_v59 }
 0x2b7   :  { %3386 = vmatmul.mubr.f32.vlgmr.msra.gmra.mxu1 %v2134_v49  ;;  %3392 = vmatprep.subr.mxu0 %v4966_v31 }
 0x2b8   :  { %3424 = vmatpush3.msra.mxu1 %v4700_v36  ;;  %3393 = vmatpush3.msra.mxu0 %v4966_v31  ;;  %v4995_v36 = vld [vmem:[%s5208_s5 + $0x150] sm:$0xff] }
 0x2b9   :  { %3425 = vmatprep.subr.mxu1 %v4707_v40  ;;  %3394 = vmatprep.subr.mxu0 %v4974_v55  ;;  %v4986_v27 = vld [vmem:[#allocation2] sm:$0xff]  ;;  %v5080_v39 = vld [vmem:[#allocation2 + $0x8] sm:$0xff] }
 0x2ba   :  { %3426 = vmatpush3.msra.mxu1 %v4707_v40  ;;  %3395 = vmatpush3.msra.mxu0 %v4974_v55  ;;  %v5004_v40 = vld [vmem:[%s5208_s5 + $0x148] sm:$0xff]  ;;  %v2393_v50 = vrot.slane %v4986_v27, 1  ;;  %v2477_v1 = vrot.slane %v4986_v27, 2  ;;  %v2478_v26 = vrot.slane %v5080_v39, 2 }
 0x2bb   :  { %3427 = vmatprep.subr.mxu1 %v4720_v42  ;;  %3396 = vmatprep.subr.mxu0 %v4982_v0 }
 0x2bc   :  { %3428 = vmatpush3.msra.mxu1 %v4720_v42  ;;  %3455 = vmatprep.mubr.f32.mxu1 %v4986_v27  ;;  %v5013_v42 = vld [vmem:[%s5208_s5 + $0x140] sm:$0xff] }
 0x2bd   :  { %3397 = vmatpush3.msra.mxu0 %v4982_v0  ;;  %3429 = vmatprep.subr.mxu1 %v4734_v47 }
 0x2be   :  { %3398 = vmatprep.subr.mxu0 %v4995_v36  ;;  %3430 = vmatpush3.msra.mxu1 %v4734_v47  ;;  %v5022_v47 = vld [vmem:[%s5208_s5 + $0x138] sm:$0xff] }
 0x2bf   :  { %3399 = vmatpush3.msra.mxu0 %v4995_v36  ;;  %3431 = vmatprep.subr.mxu1 %v4748_v53 }
 0x2c0   :  { %3400 = vmatprep.subr.mxu0 %v5004_v40  ;;  %3432 = vmatpush3.msra.mxu1 %v4748_v53  ;;  %v5031_v53 = vld [vmem:[%s5208_s5 + $0x130] sm:$0xff] }
 0x2c1   :  { %3401 = vmatpush3.msra.mxu0 %v5004_v40  ;;  %3433 = vmatprep.subr.mxu1 %v4762_v2 }
 0x2c2   :  { %3402 = vmatprep.subr.mxu0 %v5013_v42  ;;  %3434 = vmatpush3.msra.mxu1 %v4762_v2  ;;  %v5040_v2 = vld [vmem:[%s5208_s5 + $0x128] sm:$0xff] }
 0x2c3   :  { %3403 = vmatpush3.msra.mxu0 %v5013_v42  ;;  %3435 = vmatprep.subr.mxu1 %v4776_v8 }
 0x2c4   :  { %3404 = vmatprep.subr.mxu0 %v5022_v47  ;;  %3436 = vmatpush3.msra.mxu1 %v4776_v8  ;;  %v5049_v8 = vld [vmem:[%s5208_s5 + $0x120] sm:$0xff] }
 0x2c5   :  { %3405 = vmatpush3.msra.mxu0 %v5022_v47  ;;  %3437 = vmatprep.subr.mxu1 %v4790_v11 }
 0x2c6   :  { %3406 = vmatprep.subr.mxu0 %v5031_v53  ;;  %3438 = vmatpush3.msra.mxu1 %v4790_v11  ;;  %v5058_v11 = vld [vmem:[%s5208_s5 + $0x118] sm:$0xff] }
 0x2c7   :  { %3407 = vmatpush3.msra.mxu0 %v5031_v53  ;;  %3439 = vmatprep.subr.mxu1 %v4804_v17 }
 0x2c8   :  { %3408 = vmatprep.subr.mxu0 %v5040_v2  ;;  %3440 = vmatpush3.msra.mxu1 %v4804_v17  ;;  %v5067_v17 = vld [vmem:[%s5208_s5 + $0x110] sm:$0xff] }
 0x2c9   :  { %3409 = vmatpush3.msra.mxu0 %v5040_v2  ;;  %3441 = vmatprep.subr.mxu1 %v4818_v54 }
 0x2ca   :  { %3410 = vmatprep.subr.mxu0 %v5049_v8  ;;  %3442 = vmatpush3.msra.mxu1 %v4818_v54  ;;  %v5076_v54 = vld [vmem:[%s5208_s5 + $0x108] sm:$0xff] }
 0x2cb   :  { %3411 = vmatpush3.msra.mxu0 %v5049_v8  ;;  %3443 = vmatprep.subr.mxu1 %v4834_v43 }
 0x2cc   :  { %3412 = vmatprep.subr.mxu0 %v5058_v11  ;;  %3444 = vmatpush3.msra.mxu1 %v4834_v43  ;;  %v5087_v43 = vld [vmem:[%s5208_s5 + $0x100] sm:$0xff] }
 0x2cd   :  { %3413 = vmatpush3.msra.mxu0 %v5058_v11  ;;  %3445 = vmatprep.subr.mxu1 %v4848_v60 }
 0x2ce   :  { %3414 = vmatprep.subr.mxu0 %v5067_v17  ;;  %3446 = vmatpush3.msra.mxu1 %v4848_v60  ;;  %v2394_v60 = vrot.slane %v5080_v39, 1 }
 0x2cf   :  { %3415 = vmatpush3.msra.mxu0 %v5067_v17  ;;  %3447 = vmatprep.subr.mxu1 %v4862_v63 }
 0x2d0   :  { %3416 = vmatprep.subr.mxu0 %v5076_v54  ;;  %3448 = vmatpush3.msra.mxu1 %v4862_v63  ;;  %v2218_v63 = vsel %vm303_vm2, %v2215_v34, %v2217_v44 }
 0x2d1   :  { %3417 = vmatpush3.msra.mxu0 %v5076_v54  ;;  %3449 = vmatprep.subr.mxu1 %v4874_v56 }
 0x2d2   :  { %3418 = vmatprep.subr.mxu0 %v5087_v43  ;;  %3450 = vmatpush3.msra.mxu1 %v4874_v56  ;;  %v2395_v56 = vsel %vm134_vm0, %v2393_v50, %v2394_v60 }
 0x2d3   :  { %3419 = vmatpush3.msra.mxu0 %v5087_v43  ;;  %3451 = vmatprep.subr.mxu1 %v4886_v38 }
 0x2d4   :  { %3421 = vmatmul.mubr.f32.vlgmr.msra.gmra.mxu0 %v2218_v63  ;;  %3452 = vmatpush3.msra.mxu1 %v4886_v38  ;;  %v2479_v38 = vsel %vm303_vm2, %v2477_v1, %v2478_v26 }
 0x2d5   :  { %3458 = vmatprep.subr.mxu0 %v4713_v41  ;;  %3453 = vmatprep.subr.mxu1 %v4900_v15 }
 0x2d6   :  { %3459 = vmatpush3.msra.mxu0 %v4713_v41  ;;  %3490 = vmatprep.mubr.f32.mxu0 %v2395_v56  ;;  %v2310_v41 = vld [vmem:[#allocation2 + $0x10] sm:$0x3] }
 0x2d7   :  { %3454 = vmatpush3.msra.mxu1 %v4900_v15  ;;  %3460 = vmatprep.subr.mxu0 %v4727_v46 }
 0x2d8   :  { %3456 = vmatmul.mubr.f32.vlgmr.msra.gmra.mxu1 %v5080_v39  ;;  %3461 = vmatpush3.msra.mxu0 %v4727_v46  ;;  %v2396_v46 = vrot.slane %v2310_v41, 1 }
 0x2d9   :  { %3493 = vmatprep.subr.mxu1 %v4918_v3  ;;  %3462 = vmatprep.subr.mxu0 %v4741_v48 }
 0x2da   :  { %3494 = vmatpush3.msra.mxu1 %v4918_v3  ;;  %3525 = vmatprep.mubr.f32.mxu1 %v2479_v38 }
 0x2db   :  { %3463 = vmatpush3.msra.mxu0 %v4741_v48  ;;  %3495 = vmatprep.subr.mxu1 %v4952_v32  ;;  %v2480_v48 = vrot.slane %v2310_v41, 2 }
 0x2dc   :  { %3464 = vmatprep.subr.mxu0 %v4755_v58  ;;  %3496 = vmatpush3.msra.mxu1 %v4952_v32 }
 0x2dd   :  { %3465 = vmatpush3.msra.mxu0 %v4755_v58  ;;  %3497 = vmatprep.subr.mxu1 %v4966_v31  ;;  %v2397_v58 = vsel %vm134_vm0, %v2394_v60, %v2396_v46 }
 0x2de   :  { %3466 = vmatprep.subr.mxu0 %v4769_v5  ;;  %3498 = vmatpush3.msra.mxu1 %v4966_v31 }
 0x2df   :  { %3467 = vmatpush3.msra.mxu0 %v4769_v5  ;;  %3499 = vmatprep.subr.mxu1 %v4974_v55  ;;  %v2481_v5 = vsel %vm303_vm2, %v2478_v26, %v2480_v48 }
 0x2e0   :  { %3468 = vmatprep.subr.mxu0 %v4783_v9  ;;  %3500 = vmatpush3.msra.mxu1 %v4974_v55 }
 0x2e1   :  { %3469 = vmatpush3.msra.mxu0 %v4783_v9  ;;  %3501 = vmatprep.subr.mxu1 %v4982_v0 }
 0x2e2   :  { %3470 = vmatprep.subr.mxu0 %v4797_v14  ;;  %3502 = vmatpush3.msra.mxu1 %v4982_v0 }
 0x2e3   :  { %3471 = vmatpush3.msra.mxu0 %v4797_v14  ;;  %3503 = vmatprep.subr.mxu1 %v4995_v36  ;;  %v2583_v14 = vld [vmem:[%s5211_s6] ss:$0 sm:$0xff] }
 0x2e4   :  { %3472 = vmatprep.subr.mxu0 %v4811_v33  ;;  %3504 = vmatpush3.msra.mxu1 %v4995_v36  ;;  %v2312_v23 = vadd.f32 %v2583_v14, %v4323_v37  ;;  %v2311_v28 = vadd.f32 %v2583_v14, %v5325_v25 }
 0x2e5   :  { %3473 = vmatpush3.msra.mxu0 %v4811_v33  ;;  %3505 = vmatprep.subr.mxu1 %v5004_v40  ;;  %v5323_v33 = vld [vmem:[#allocation32_spill] sm:$0xff] }
 0x2e6   :  { %3474 = vmatprep.subr.mxu0 %v4825_v6  ;;  %3506 = vmatpush3.msra.mxu1 %v5004_v40 }
 0x2e7   :  { %3475 = vmatpush3.msra.mxu0 %v4825_v6  ;;  %3507 = vmatprep.subr.mxu1 %v5013_v42  ;;  %v2049_v6 = vadd.f32 %v2583_v14, %v5323_v33 }
 0x2e8   :  { %3476 = vmatprep.subr.mxu0 %v4841_v16  ;;  %3508 = vmatpush3.msra.mxu1 %v5013_v42 }
 0x2e9   :  { %3477 = vmatpush3.msra.mxu0 %v4841_v16  ;;  %3509 = vmatprep.subr.mxu1 %v5022_v47 }
 0x2ea   :  { %3478 = vmatprep.subr.mxu0 %v4855_v12  ;;  %3510 = vmatpush3.msra.mxu1 %v5022_v47 }
 0x2eb   :  { %3479 = vmatpush3.msra.mxu0 %v4855_v12  ;;  %3511 = vmatprep.subr.mxu1 %v5031_v53 }
 0x2ec   :  { %3480 = vmatprep.subr.mxu0 %v4869_v22  ;;  %3512 = vmatpush3.msra.mxu1 %v5031_v53 }
 0x2ed   :  { %3481 = vmatpush3.msra.mxu0 %v4869_v22  ;;  %3513 = vmatprep.subr.mxu1 %v5040_v2 }
 0x2ee   :  { %3482 = vmatprep.subr.mxu0 %v4879_v62  ;;  %3514 = vmatpush3.msra.mxu1 %v5040_v2 }
 0x2ef   :  { %3483 = vmatpush3.msra.mxu0 %v4879_v62  ;;  %3515 = vmatprep.subr.mxu1 %v5049_v8  ;;  %v5324_v62 = vld [vmem:[#allocation30_spill] sm:$0xff] }
 0x2f0   :  { %3484 = vmatprep.subr.mxu0 %v4893_v51  ;;  %3516 = vmatpush3.msra.mxu1 %v5049_v8 }
 0x2f1   :  { %3485 = vmatpush3.msra.mxu0 %v4893_v51  ;;  %3517 = vmatprep.subr.mxu1 %v5058_v11  ;;  %v2048_v51 = vadd.f32 %v2583_v14, %v5324_v62 }
 0x2f2   :  { %3486 = vmatprep.subr.mxu0 %v4907_v45  ;;  %3518 = vmatpush3.msra.mxu1 %v5058_v11 }
 0x2f3   :  { %3487 = vmatpush3.msra.mxu0 %v4907_v45  ;;  %3519 = vmatprep.subr.mxu1 %v5067_v17 }
 0x2f4   :  { %3488 = vmatprep.subr.mxu0 %v4925_v61  ;;  %3520 = vmatpush3.msra.mxu1 %v5067_v17 }
 0x2f5   :  { %3489 = vmatpush3.msra.mxu0 %v4925_v61  ;;  %3521 = vmatprep.subr.mxu1 %v5076_v54 }
 0x2f6   :  { %3491 = vmatmul.mubr.f32.vlgmr.msra.gmra.mxu0 %v2397_v58  ;;  %3522 = vmatpush3.msra.mxu1 %v5076_v54 }
 0x2f7   :  { %3523 = vmatprep.subr.mxu1 %v5087_v43 }
 0x2f8   :  { %3524 = vmatpush3.msra.mxu1 %v5087_v43 }
 0x2f9   :  { %3526 = vmatmul.mubr.f32.vlgmr.msra.gmra.mxu1 %v2481_v5 }
 0x373   :  { %v3352_v9 = vpop.f32.mrf.mxu0 }
 0x374   :  { %v2126_v22 = vadd.f32 %v3352_v9, %v2049_v6 }
 0x375   :  { %v2116_v16 = vpop.f32.mrf.mxu0 }
 0x376   :  { %v2125_v15 = vadd.f32 %v2116_v16, %v2048_v51 }
 0x377   :  { %v3387_v12 = vpop.f32.mrf.mxu1 }
 0x378   :  { %v2213_v3 = vadd.f32 %v3387_v12, %v2126_v22 }
 0x379   :  { %v2203_v45 = vpop.f32.mrf.mxu1 }
 0x37a   :  { %v2212_v57 = vadd.f32 %v2203_v45, %v2125_v15 }
 0x394   :  { %v3422_v61 = vpop.f32.mrf.mxu0 }
 0x395   :  { %v2297_v4 = vadd.f32 %v3422_v61, %v2213_v3 }
 0x396   :  { %v2287_v18 = vpop.f32.mrf.mxu0 }
 0x397   :  { %2299 = vst [vmem:[%s5212_s8 + $0x8] sm:$0xff] %v2297_v4  ;;  %v2296_v20 = vadd.f32 %v2287_v18, %v2212_v57 }
 0x398   :  { %v3457_v21 = vpop.f32.mrf.mxu1 }
 0x399   :  { %2298 = vst [vmem:[%s5212_s8] sm:$0xff] %v2296_v20  ;;  %v2389_v10 = vadd.f32 %v3457_v21, %v2312_v23 }
 0x39a   :  { %v2379_v24 = vpop.f32.mrf.mxu1 }
 0x39b   :  { %v2388_v7 = vadd.f32 %v2379_v24, %v2311_v28 }
 0x3b6   :  { %v3492_v13 = vpop.f32.mrf.mxu0 }
 0x3b7   :  { %v2476_v32 = vadd.f32 %v3492_v13, %v2389_v10 }
 0x3b8   :  { %v2466_v19 = vpop.f32.mrf.mxu0 }
 0x3b9   :  { %v2475_v29 = vadd.f32 %v2466_v19, %v2388_v7  ;;  %v3527_v30 = vpop.f32.mrf.mxu1 }
 0x3ba   :  { %v2560_v34 = vadd.f32 %v3527_v30, %v2476_v32 }
 0x3bb   :  { %v2550_v35 = vpop.f32.mrf.mxu1 }
 0x3bc   :  { %2585 = vst [vmem:[%s5212_s8 + $0x18] sm:$0xff] %v2560_v34  ;;  %v2559_v52 = vadd.f32 %v2550_v35, %v2475_v29 }
 0x3be   :  { %2584 = vst [vmem:[%s5212_s8 + $0x10] sm:$0xff] %v2559_v52 }

</bundles_post_ra>
